<compile_context>
chip_gen: v5e
topology: v5e:2x2
jax: 0.10.0
libtpu: 0.0.40
codegen_flags: <defaults>
</compile_context>

<pallas_src>
import functools
import math

import jax
import jax.numpy as jnp
from jax.experimental import pallas as pl
from jax.experimental.pallas import tpu as pltpu

CONFIG = dict(num_features=16, filters=(32, 32, 32), tensor_neurons=16,
              reduction=4, dropout=0.0)

# torch_geometric GINConv(nn, eps=True) -> eps buffer = float(True) = 1.0
GIN_EPS = 1.0

# ----------------------------------------------------------------------------- layout
_F = 32          # filter width (all levels)
_L = 3           # number of GIN levels
_K = 16          # tensor neurons
_C = 96          # sum(filters)
_H = 24          # C // reduction
_NF = 16         # num_features
_NMAX = 32       # padded node count per pair (graph1 + graph2)

# weight slab: (384, 128) f32, four 32-lane column slots per row group
_R_HEAD = 96     # slots: wc2 | ws1 | ws2 | wss1
_R_MISC = 128    # slots: wss2 | wc1 (96 rows) | Vstack (64 rows) | -
_R_W3 = 224      # 4 x (32, 128) chunks of W3 flattened to (32, 512)
_R_BIAS = 352    # one (1, 32) bias / scalar per row, lanes [0:32]
_R_TOTAL = 384

def _b_lvl(l, j):          # j: 0=b1 1=b2 2=b_in 3=b_out 4=ln_g 5=ln_b
    return _R_BIAS + 6 * l + j

_B_BC1, _B_BC2, _B_BS1, _B_BS2 = 370, 371, 372, 373
_B_B3, _B_BSS1, _B_BSS2 = 374, 375, 376
_B_ALPHA, _B_BETA, _B_GAMMA = 377, 378, 379


# ----------------------------------------------------------------------------- kernel
def _eric_kernel(x_ref, a_ref, pool_ref, w_ref, o_ref, *, training):
    """Full ERIC forward for one graph pair (both graphs block-diagonal)."""
    f32 = jnp.float32

    def W(r, s, rows=_F):                      # (rows, 32) weight tile at slot s
        return w_ref[r:r + rows, 32 * s:32 * s + 32]

    def B(r):                                  # (1, 32) bias / scalar row
        return w_ref[r:r + 1, 0:32]

    def dot(a, b):
        return jnp.dot(a, b, preferred_element_type=f32)

    x = x_ref[0]                               # (NMAX, F), zero-padded rows/cols
    adj = a_ref[0]                             # (NMAX, NMAX), block-diag, (1+eps)I folded
    pool = pool_ref[0]                         # (2, NMAX) per-graph membership masks

    # ---- shared GIN stack over both graphs -----------------------------------
    convs, outs = [], []
    for l in range(_L):
        rw, rb = 32 * l, _b_lvl(l, 0)
        agg = dot(adj, x)                                        # GIN aggregation
        h = jnp.maximum(dot(agg, W(rw, 0)) + B(rb), 0.0)
        h = dot(h, W(rw, 1)) + B(rb + 1)                         # lvl0: BN folded
        if l > 0:                                                # LayerNorm
            mu = jnp.mean(h, axis=-1, keepdims=True)
            var = jnp.mean((h - mu) ** 2, axis=-1, keepdims=True)
            h = (h - mu) * jax.lax.rsqrt(var + 1e-5) * B(rb + 4) + B(rb + 5)
        conv = jnp.maximum(h, 0.0)                               # ReLU (dropout id)
        inner = jnp.maximum(dot(conv, W(rw, 2)) + B(rb + 2), 0.0)
        pooled = dot(pool, inner)                                # (2, F) per-graph sums
        out = jnp.maximum(dot(pooled, W(rw, 3)) + B(rb + 3), 0.0)
        convs.append(conv)
        outs.append(out)
        x = conv

    # ---- conv_stack + score head (single lane-concat matmul) -----------------
    dcat = jnp.concatenate(
        [jnp.exp(-(o[0:1] - o[1:2]) ** 2) for o in outs], axis=-1)   # (1, 96)
    h1 = jnp.maximum(dot(dcat, W(_R_MISC, 1, rows=96)) + B(_B_BC1), 0.0)
    score_rep = jnp.tanh(dot(h1, W(_R_HEAD, 0)) + B(_B_BC2))
    s = jnp.maximum(dot(score_rep, W(_R_HEAD, 1)) + B(_B_BS1), 0.0)
    score = jax.nn.sigmoid(dot(s, W(_R_HEAD, 2))[0:1, 0:1]
                           + B(_B_BS2)[0:1, 0:1])

    # ---- NTN on the last level's graph embeddings -----------------------------
    hi, hj = outs[-1][0:1], outs[-1][1:2]
    u = jnp.concatenate(                      # hi @ W3_flat, 4 x (1,128) chunks
        [dot(hi, w_ref[_R_W3 + 32 * c:_R_W3 + 32 * (c + 1), :]) for c in range(4)],
        axis=-1)                                                  # (1, K*F)
    hj_rep = jnp.concatenate([hj] * _K, axis=-1)                  # lane tile, no MXU
    p = u * hj_rep
    parts = [jnp.sum(p[:, k * _F:(k + 1) * _F], axis=-1, keepdims=True)
             for k in range(_K)]                                  # block-sums on XLU
    parts.append(jnp.zeros((1, _F - _K), f32))
    term1 = jnp.concatenate(parts, axis=-1)                       # (1, 32) padded
    term2 = dot(jnp.concatenate([hi, hj], axis=-1), W(_R_MISC, 2, rows=64))
    sim_rep = jnp.maximum(term1 + term2 + B(_B_B3), 0.0)
    ss = jnp.maximum(dot(sim_rep, W(_R_HEAD, 3)) + B(_B_BSS1), 0.0)
    sim_score = jax.nn.sigmoid(dot(ss, W(_R_MISC, 0))[0:1, 0:1]
                               + B(_B_BSS2)[0:1, 0:1])

    comb = B(_B_ALPHA)[0:1, 0:1] * score + B(_B_BETA)[0:1, 0:1] * sim_score

    # ---- GCL contrastive term (training only), embeddings never hit HBM ------
    if training:
        z = jnp.concatenate(convs, axis=-1)                       # (NMAX, 3F)
        g = dot(pool, z)                                          # (2, 3F) graph sums
        sim = jax.lax.dot_general(z, g, (((1,), (1,)), ((), ())),
                                  preferred_element_type=f32)     # (NMAX, 2)
        ep = math.log(2.0) - jax.nn.softplus(-sim)
        ediff = ep[:, 0:1] - ep[:, 1:2]                           # (NMAX, 1)
        mask = pool[0:1] + pool[1:2]                              # real-node mask
        lsum = dot(mask, ediff)                                   # L1 - L2, (1, 1)
        lcl = jnp.tanh(B(_B_GAMMA)[0:1, 0:1] * lsum)
    else:
        lcl = jnp.zeros((1, 1), f32)

    # ---- single lane-dense output block ---------------------------------------
    row0 = jnp.concatenate([comb, lcl, jnp.zeros((1, 126), f32)], axis=-1)
    o_ref[0] = jnp.concatenate([row0, jnp.zeros((7, 128), f32)], axis=0)


# ----------------------------------------------------------------------------- wrapper
def eric_forward(param_slab, x, adj, pool, training=False):
    """Score a batch of graph pairs.  x:(B,NMAX,F) adj:(B,NMAX,NMAX) pool:(B,2,NMAX)."""
    B, nmax, _ = x.shape
    kernel = functools.partial(_eric_kernel, training=training)
    out = pl.pallas_call(
        kernel,
        out_shape=jax.ShapeDtypeStruct((B, 8, 128), jnp.float32),
        grid=(B,),
        in_specs=[
            pl.BlockSpec((1, nmax, _F), lambda p: (p, 0, 0)),
            pl.BlockSpec((1, nmax, nmax), lambda p: (p, 0, 0)),
            pl.BlockSpec((1, 2, nmax), lambda p: (p, 0, 0)),
            pl.BlockSpec((_R_TOTAL, 128), lambda p: (0, 0)),   # fetched once
        ],
        out_specs=pl.BlockSpec((1, 8, 128), lambda p: (p, 0, 0)),
        compiler_params=pltpu.CompilerParams(
            dimension_semantics=("parallel",),
            vmem_limit_bytes=32 * 1024 * 1024),
    )(x, adj, pool, param_slab)
    return out[:, 0, 0], out[:, 0, 1]          # (B,) comb_score, (B,) L_cl


# ----------------------------------------------------------------------------- params
def _xavier(key, shape):
    fan_in, fan_out = shape[-2], shape[-1]
    a = math.sqrt(6.0 / (fan_in + fan_out))
    return jax.random.uniform(key, shape, jnp.float32, -a, a)


def init_params(key):
    keys = iter(jax.random.split(key, 64))
    nk = lambda: next(keys)
    xavier = lambda shape: _xavier(nk(), shape)
    small = lambda shape: jax.random.uniform(nk(), shape, jnp.float32, -0.1, 0.1)

    slab = jnp.zeros((_R_TOTAL, 128), jnp.float32)

    def put(sl, r, s, m):
        m = jnp.asarray(m, jnp.float32)
        return sl.at[r:r + m.shape[0], 32 * s:32 * s + m.shape[1]].set(m)

    in_dim = _NF
    for l in range(_L):
        w1 = xavier((in_dim, _F)); b1 = small((1, _F))
        w2 = xavier((_F, _F));     b2 = small((1, _F))
        w_in = xavier((_F, _F));   b_in = small((1, _F))
        w_out = xavier((_F, _F));  b_out = small((1, _F))
        if l == 0:   # eval-mode BatchNorm1d folded into w2 / b2
            g = 1.0 + 0.1 * jax.random.normal(nk(), (1, _F), jnp.float32)
            b = 0.1 * jax.random.normal(nk(), (1, _F), jnp.float32)
            rmean = 0.1 * jax.random.normal(nk(), (1, _F), jnp.float32)
            rvar = 1.0 + 0.1 * jax.random.uniform(nk(), (1, _F), jnp.float32)
            scale = g / jnp.sqrt(rvar + 1e-5)
            w2 = w2 * scale
            b2 = b2 * scale + (b - rmean * scale)
            ln_g = jnp.ones((1, _F), jnp.float32)
            ln_b = jnp.zeros((1, _F), jnp.float32)
        else:
            ln_g = 1.0 + 0.1 * jax.random.normal(nk(), (1, _F), jnp.float32)
            ln_b = 0.1 * jax.random.normal(nk(), (1, _F), jnp.float32)
        slab = put(slab, 32 * l, 0, w1)    # (in_dim,F) zero-padded rows (lvl 0)
        slab = put(slab, 32 * l, 1, w2)
        slab = put(slab, 32 * l, 2, w_in)
        slab = put(slab, 32 * l, 3, w_out)
        for j, v in enumerate((b1, b2, b_in, b_out, ln_g, ln_b)):
            slab = put(slab, _b_lvl(l, j), 0, v)
        in_dim = _F

    wc1 = xavier((_C, _H));  bc1 = small((1, _H))
    wc2 = xavier((_H, _H));  bc2 = small((1, _H))
    ws1 = xavier((_H, 16));  bs1 = small((1, 16))
    ws2 = xavier((16, 1));   bs2 = small((1, 1))
    wss1 = xavier((_K, _K)); bss1 = small((1, _K))
    wss2 = xavier((_K, 1));  bss2 = small((1, 1))
    w3 = xavier((_K, _F, _F))
    v = xavier((_K, 2 * _F))
    b3 = xavier((1, _K))

    slab = put(slab, _R_HEAD, 0, wc2)
    slab = put(slab, _R_HEAD, 1, ws1)
    slab = put(slab, _R_HEAD, 2, ws2)
    slab = put(slab, _R_HEAD, 3, wss1)
    slab = put(slab, _R_MISC, 0, wss2)
    slab = put(slab, _R_MISC, 1, wc1)
    slab = put(slab, _R_MISC, 2, v.T)              # (2F, K) = [V_hi ; V_hj]
    w3flat = jnp.transpose(w3, (1, 0, 2)).reshape(_F, _K * _F)
    for c in range(4):
        slab = slab.at[_R_W3 + 32 * c:_R_W3 + 32 * (c + 1), :].set(
            w3flat[:, 128 * c:128 * (c + 1)])
    for row, val in ((_B_BC1, bc1), (_B_BC2, bc2), (_B_BS1, bs1), (_B_BS2, bs2),
                     (_B_B3, b3), (_B_BSS1, bss1), (_B_BSS2, bss2),
                     (_B_ALPHA, jnp.full((1, 1), 0.6, jnp.float32)),
                     (_B_BETA, jnp.full((1, 1), 0.4, jnp.float32)),
                     (_B_GAMMA, jnp.full((1, 1), 0.5, jnp.float32))):
        slab = put(slab, row, 0, val)
    return slab


# ----------------------------------------------------------------------------- data
def make_ring_adj(n):
    src = jnp.arange(n)
    dst = (src + 1) % n
    a = jnp.zeros((n, n), jnp.float32)
    return a.at[dst, src].add(1.0).at[src, dst].add(1.0)


def prepare_pair(feat1, adj1, feat2, adj2, nmax=_NMAX):
    """Pack one graph pair into the fixed-size block-diagonal layout."""
    n1, n2 = feat1.shape[0], feat2.shape[0]
    assert n1 + n2 <= nmax
    x = jnp.zeros((nmax, _F), jnp.float32)
    x = x.at[:n1, :feat1.shape[1]].set(feat1.astype(jnp.float32))
    x = x.at[n1:n1 + n2, :feat2.shape[1]].set(feat2.astype(jnp.float32))
    a = jnp.zeros((nmax, nmax), jnp.float32)
    a = a.at[:n1, :n1].set(adj1 + (1.0 + GIN_EPS) * jnp.eye(n1, dtype=jnp.float32))
    a = a.at[n1:n1 + n2, n1:n1 + n2].set(
        adj2 + (1.0 + GIN_EPS) * jnp.eye(n2, dtype=jnp.float32))
    pool = jnp.zeros((2, nmax), jnp.float32)
    pool = pool.at[0, :n1].set(1.0).at[1, n1:n1 + n2].set(1.0)
    return x, a, pool


# ----------------------------------------------------------------------------- main
if __name__ == "__main__":
    key = jax.random.PRNGKey(0)
    kp, kf = jax.random.split(key)
    params = init_params(kp)

    sizes = [(8, 12), (10, 14), (6, 9), (12, 16)]     # B = 4 graph pairs
    fk = iter(jax.random.split(kf, 2 * len(sizes)))
    xs, adjs, pools = [], [], []
    for n1, n2 in sizes:
        f1 = jax.random.normal(next(fk), (n1, _NF), jnp.float32)
        f2 = jax.random.normal(next(fk), (n2, _NF), jnp.float32)
        x, a, p = prepare_pair(f1, make_ring_adj(n1), f2, make_ring_adj(n2))
        xs.append(x); adjs.append(a); pools.append(p)
    X, A, POOL = jnp.stack(xs), jnp.stack(adjs), jnp.stack(pools)

    comb, l_cl = eric_forward(params, X, A, POOL, training=False)      # L_cl = 0
    comb_t, l_cl_t = eric_forward(params, X, A, POOL, training=True)   # fused GCL

    jax.block_until_ready((comb, l_cl, comb_t, l_cl_t))
    print("KERNEL_OK")
</pallas_src>

<mosaic_0001>
module attributes {stable_mosaic.version = 11 : i64} {
  func.func @_eric_kernel(%arg0: i32, %arg1: memref<1x32x32xf32, #tpu.memory_space<vmem>>, %arg2: memref<1x32x32xf32, #tpu.memory_space<vmem>>, %arg3: memref<1x2x32xf32, #tpu.memory_space<vmem>>, %arg4: memref<384x128xf32, #tpu.memory_space<vmem>>, %arg5: memref<1x8x128xf32, #tpu.memory_space<vmem>>) attributes {dimension_semantics = [#tpu.dimension_semantics<parallel>], iteration_bounds = array<i64: 4>, scalar_prefetch = 0 : i64, scratch_operands = 0 : i64, tpu.core_type = #tpu.core_type<tc>, window_params = [{transform_indices = @transform_0, window_bounds = array<i64: 1, 32, 32>}, {transform_indices = @transform_1, window_bounds = array<i64: 1, 32, 32>}, {transform_indices = @transform_2, window_bounds = array<i64: 1, 2, 32>}, {pipeline_mode = #tpu.pipeline_mode<synchronous>, transform_indices = @transform_3, window_bounds = array<i64: 384, 128>}, {transform_indices = @transform_4, window_bounds = array<i64: 1, 8, 128>}]} {
    %c0 = arith.constant 0 : index
    %c0_0 = arith.constant 0 : index
    %c0_1 = arith.constant 0 : index
    %0 = vector.load %arg1[%c0, %c0_0, %c0_1] : memref<1x32x32xf32, #tpu.memory_space<vmem>>, vector<1x32x32xf32>
    %1 = vector.shape_cast %0 : vector<1x32x32xf32> to vector<32x32xf32>
    %c0_2 = arith.constant 0 : index
    %c0_3 = arith.constant 0 : index
    %c0_4 = arith.constant 0 : index
    %2 = vector.load %arg2[%c0_2, %c0_3, %c0_4] : memref<1x32x32xf32, #tpu.memory_space<vmem>>, vector<1x32x32xf32>
    %3 = vector.shape_cast %2 : vector<1x32x32xf32> to vector<32x32xf32>
    %c0_5 = arith.constant 0 : index
    %c0_6 = arith.constant 0 : index
    %c0_7 = arith.constant 0 : index
    %4 = vector.load %arg3[%c0_5, %c0_6, %c0_7] : memref<1x2x32xf32, #tpu.memory_space<vmem>>, vector<1x2x32xf32>
    %5 = vector.shape_cast %4 : vector<1x2x32xf32> to vector<2x32xf32>
    %cst = arith.constant dense<0.000000e+00> : vector<32x32xf32>
    %6 = tpu.matmul %3, %1, %cst {dimension_numbers = #tpu.dot_dimension_numbers<[1], [0], [0], [1], [0, 0, 1, 1], [], []>} : vector<32x32xf32>, vector<32x32xf32>, vector<32x32xf32> -> vector<32x32xf32>
    %c0_8 = arith.constant 0 : index
    %c0_9 = arith.constant 0 : index
    %7 = vector.load %arg4[%c0_8, %c0_9] : memref<384x128xf32, #tpu.memory_space<vmem>>, vector<32x32xf32>
    %cst_10 = arith.constant dense<0.000000e+00> : vector<32x32xf32>
    %8 = tpu.matmul %6, %7, %cst_10 {dimension_numbers = #tpu.dot_dimension_numbers<[1], [0], [0], [1], [0, 0, 1, 1], [], []>} : vector<32x32xf32>, vector<32x32xf32>, vector<32x32xf32> -> vector<32x32xf32>
    %c352 = arith.constant 352 : index
    %c0_11 = arith.constant 0 : index
    %9 = vector.load %arg4[%c352, %c0_11] : memref<384x128xf32, #tpu.memory_space<vmem>>, vector<1x32xf32>
    %10 = vector.broadcast %9 : vector<1x32xf32> to vector<32x32xf32>
    %11 = arith.addf %8, %10 : vector<32x32xf32>
    %cst_12 = arith.constant 0.000000e+00 : f32
    %12 = vector.broadcast %cst_12 : f32 to vector<32x32xf32>
    %13 = arith.maximumf %11, %12 : vector<32x32xf32>
    %c0_13 = arith.constant 0 : index
    %c32 = arith.constant 32 : index
    %14 = vector.load %arg4[%c0_13, %c32] : memref<384x128xf32, #tpu.memory_space<vmem>>, vector<32x32xf32>
    %cst_14 = arith.constant dense<0.000000e+00> : vector<32x32xf32>
    %15 = tpu.matmul %13, %14, %cst_14 {dimension_numbers = #tpu.dot_dimension_numbers<[1], [0], [0], [1], [0, 0, 1, 1], [], []>} : vector<32x32xf32>, vector<32x32xf32>, vector<32x32xf32> -> vector<32x32xf32>
    %c353 = arith.constant 353 : index
    %c0_15 = arith.constant 0 : index
    %16 = vector.load %arg4[%c353, %c0_15] : memref<384x128xf32, #tpu.memory_space<vmem>>, vector<1x32xf32>
    %17 = vector.broadcast %16 : vector<1x32xf32> to vector<32x32xf32>
    %18 = arith.addf %15, %17 : vector<32x32xf32>
    %cst_16 = arith.constant 0.000000e+00 : f32
    %19 = vector.broadcast %cst_16 : f32 to vector<32x32xf32>
    %20 = arith.maximumf %18, %19 : vector<32x32xf32>
    %c0_17 = arith.constant 0 : index
    %c64 = arith.constant 64 : index
    %21 = vector.load %arg4[%c0_17, %c64] : memref<384x128xf32, #tpu.memory_space<vmem>>, vector<32x32xf32>
    %cst_18 = arith.constant dense<0.000000e+00> : vector<32x32xf32>
    %22 = tpu.matmul %20, %21, %cst_18 {dimension_numbers = #tpu.dot_dimension_numbers<[1], [0], [0], [1], [0, 0, 1, 1], [], []>} : vector<32x32xf32>, vector<32x32xf32>, vector<32x32xf32> -> vector<32x32xf32>
    %c354 = arith.constant 354 : index
    %c0_19 = arith.constant 0 : index
    %23 = vector.load %arg4[%c354, %c0_19] : memref<384x128xf32, #tpu.memory_space<vmem>>, vector<1x32xf32>
    %24 = vector.broadcast %23 : vector<1x32xf32> to vector<32x32xf32>
    %25 = arith.addf %22, %24 : vector<32x32xf32>
    %cst_20 = arith.constant 0.000000e+00 : f32
    %26 = vector.broadcast %cst_20 : f32 to vector<32x32xf32>
    %27 = arith.maximumf %25, %26 : vector<32x32xf32>
    %cst_21 = arith.constant dense<0.000000e+00> : vector<2x32xf32>
    %28 = tpu.matmul %5, %27, %cst_21 {dimension_numbers = #tpu.dot_dimension_numbers<[1], [0], [0], [1], [0, 0, 1, 1], [], []>} : vector<2x32xf32>, vector<32x32xf32>, vector<2x32xf32> -> vector<2x32xf32>
    %c0_22 = arith.constant 0 : index
    %c96 = arith.constant 96 : index
    %29 = vector.load %arg4[%c0_22, %c96] : memref<384x128xf32, #tpu.memory_space<vmem>>, vector<32x32xf32>
    %cst_23 = arith.constant dense<0.000000e+00> : vector<2x32xf32>
    %30 = tpu.matmul %28, %29, %cst_23 {dimension_numbers = #tpu.dot_dimension_numbers<[1], [0], [0], [1], [0, 0, 1, 1], [], []>} : vector<2x32xf32>, vector<32x32xf32>, vector<2x32xf32> -> vector<2x32xf32>
    %c355 = arith.constant 355 : index
    %c0_24 = arith.constant 0 : index
    %31 = vector.load %arg4[%c355, %c0_24] : memref<384x128xf32, #tpu.memory_space<vmem>>, vector<1x32xf32>
    %32 = vector.broadcast %31 : vector<1x32xf32> to vector<2x32xf32>
    %33 = arith.addf %30, %32 : vector<2x32xf32>
    %cst_25 = arith.constant 0.000000e+00 : f32
    %34 = vector.broadcast %cst_25 : f32 to vector<2x32xf32>
    %35 = arith.maximumf %33, %34 : vector<2x32xf32>
    %cst_26 = arith.constant dense<0.000000e+00> : vector<32x32xf32>
    %36 = tpu.matmul %3, %20, %cst_26 {dimension_numbers = #tpu.dot_dimension_numbers<[1], [0], [0], [1], [0, 0, 1, 1], [], []>} : vector<32x32xf32>, vector<32x32xf32>, vector<32x32xf32> -> vector<32x32xf32>
    %c32_27 = arith.constant 32 : index
    %c0_28 = arith.constant 0 : index
    %37 = vector.load %arg4[%c32_27, %c0_28] : memref<384x128xf32, #tpu.memory_space<vmem>>, vector<32x32xf32>
    %cst_29 = arith.constant dense<0.000000e+00> : vector<32x32xf32>
    %38 = tpu.matmul %36, %37, %cst_29 {dimension_numbers = #tpu.dot_dimension_numbers<[1], [0], [0], [1], [0, 0, 1, 1], [], []>} : vector<32x32xf32>, vector<32x32xf32>, vector<32x32xf32> -> vector<32x32xf32>
    %c358 = arith.constant 358 : index
    %c0_30 = arith.constant 0 : index
    %39 = vector.load %arg4[%c358, %c0_30] : memref<384x128xf32, #tpu.memory_space<vmem>>, vector<1x32xf32>
    %40 = vector.broadcast %39 : vector<1x32xf32> to vector<32x32xf32>
    %41 = arith.addf %38, %40 : vector<32x32xf32>
    %cst_31 = arith.constant 0.000000e+00 : f32
    %42 = vector.broadcast %cst_31 : f32 to vector<32x32xf32>
    %43 = arith.maximumf %41, %42 : vector<32x32xf32>
    %c32_32 = arith.constant 32 : index
    %c32_33 = arith.constant 32 : index
    %44 = vector.load %arg4[%c32_32, %c32_33] : memref<384x128xf32, #tpu.memory_space<vmem>>, vector<32x32xf32>
    %cst_34 = arith.constant dense<0.000000e+00> : vector<32x32xf32>
    %45 = tpu.matmul %43, %44, %cst_34 {dimension_numbers = #tpu.dot_dimension_numbers<[1], [0], [0], [1], [0, 0, 1, 1], [], []>} : vector<32x32xf32>, vector<32x32xf32>, vector<32x32xf32> -> vector<32x32xf32>
    %c359 = arith.constant 359 : index
    %c0_35 = arith.constant 0 : index
    %46 = vector.load %arg4[%c359, %c0_35] : memref<384x128xf32, #tpu.memory_space<vmem>>, vector<1x32xf32>
    %47 = vector.broadcast %46 : vector<1x32xf32> to vector<32x32xf32>
    %48 = arith.addf %45, %47 : vector<32x32xf32>
    %cst_36 = arith.constant dense<0.000000e+00> : vector<32xf32>
    %49 = vector.multi_reduction <add>, %48, %cst_36 [1] : vector<32x32xf32> to vector<32xf32>
    %50 = vector.shape_cast %49 : vector<32xf32> to vector<32x1xf32>
    %cst_37 = arith.constant 3.200000e+01 : f32
    %51 = vector.broadcast %cst_37 : f32 to vector<32x1xf32>
    %52 = arith.divf %50, %51 : vector<32x1xf32>
    %53 = vector.broadcast %52 : vector<32x1xf32> to vector<32x32xf32>
    %54 = arith.subf %48, %53 : vector<32x32xf32>
    %55 = arith.mulf %54, %54 : vector<32x32xf32>
    %cst_38 = arith.constant dense<0.000000e+00> : vector<32xf32>
    %56 = vector.multi_reduction <add>, %55, %cst_38 [1] : vector<32x32xf32> to vector<32xf32>
    %57 = vector.shape_cast %56 : vector<32xf32> to vector<32x1xf32>
    %cst_39 = arith.constant 3.200000e+01 : f32
    %58 = vector.broadcast %cst_39 : f32 to vector<32x1xf32>
    %59 = arith.divf %57, %58 : vector<32x1xf32>
    %60 = vector.broadcast %52 : vector<32x1xf32> to vector<32x32xf32>
    %61 = arith.subf %48, %60 : vector<32x32xf32>
    %cst_40 = arith.constant 9.99999974E-6 : f32
    %62 = vector.broadcast %cst_40 : f32 to vector<32x1xf32>
    %63 = arith.addf %59, %62 : vector<32x1xf32>
    %64 = math.rsqrt %63 : vector<32x1xf32>
    %65 = vector.broadcast %64 : vector<32x1xf32> to vector<32x32xf32>
    %66 = arith.mulf %61, %65 : vector<32x32xf32>
    %c362 = arith.constant 362 : index
    %c0_41 = arith.constant 0 : index
    %67 = vector.load %arg4[%c362, %c0_41] : memref<384x128xf32, #tpu.memory_space<vmem>>, vector<1x32xf32>
    %68 = vector.broadcast %67 : vector<1x32xf32> to vector<32x32xf32>
    %69 = arith.mulf %66, %68 : vector<32x32xf32>
    %c363 = arith.constant 363 : index
    %c0_42 = arith.constant 0 : index
    %70 = vector.load %arg4[%c363, %c0_42] : memref<384x128xf32, #tpu.memory_space<vmem>>, vector<1x32xf32>
    %71 = vector.broadcast %70 : vector<1x32xf32> to vector<32x32xf32>
    %72 = arith.addf %69, %71 : vector<32x32xf32>
    %cst_43 = arith.constant 0.000000e+00 : f32
    %73 = vector.broadcast %cst_43 : f32 to vector<32x32xf32>
    %74 = arith.maximumf %72, %73 : vector<32x32xf32>
    %c32_44 = arith.constant 32 : index
    %c64_45 = arith.constant 64 : index
    %75 = vector.load %arg4[%c32_44, %c64_45] : memref<384x128xf32, #tpu.memory_space<vmem>>, vector<32x32xf32>
    %cst_46 = arith.constant dense<0.000000e+00> : vector<32x32xf32>
    %76 = tpu.matmul %74, %75, %cst_46 {dimension_numbers = #tpu.dot_dimension_numbers<[1], [0], [0], [1], [0, 0, 1, 1], [], []>} : vector<32x32xf32>, vector<32x32xf32>, vector<32x32xf32> -> vector<32x32xf32>
    %c360 = arith.constant 360 : index
    %c0_47 = arith.constant 0 : index
    %77 = vector.load %arg4[%c360, %c0_47] : memref<384x128xf32, #tpu.memory_space<vmem>>, vector<1x32xf32>
    %78 = vector.broadcast %77 : vector<1x32xf32> to vector<32x32xf32>
    %79 = arith.addf %76, %78 : vector<32x32xf32>
    %cst_48 = arith.constant 0.000000e+00 : f32
    %80 = vector.broadcast %cst_48 : f32 to vector<32x32xf32>
    %81 = arith.maximumf %79, %80 : vector<32x32xf32>
    %cst_49 = arith.constant dense<0.000000e+00> : vector<2x32xf32>
    %82 = tpu.matmul %5, %81, %cst_49 {dimension_numbers = #tpu.dot_dimension_numbers<[1], [0], [0], [1], [0, 0, 1, 1], [], []>} : vector<2x32xf32>, vector<32x32xf32>, vector<2x32xf32> -> vector<2x32xf32>
    %c32_50 = arith.constant 32 : index
    %c96_51 = arith.constant 96 : index
    %83 = vector.load %arg4[%c32_50, %c96_51] : memref<384x128xf32, #tpu.memory_space<vmem>>, vector<32x32xf32>
    %cst_52 = arith.constant dense<0.000000e+00> : vector<2x32xf32>
    %84 = tpu.matmul %82, %83, %cst_52 {dimension_numbers = #tpu.dot_dimension_numbers<[1], [0], [0], [1], [0, 0, 1, 1], [], []>} : vector<2x32xf32>, vector<32x32xf32>, vector<2x32xf32> -> vector<2x32xf32>
    %c361 = arith.constant 361 : index
    %c0_53 = arith.constant 0 : index
    %85 = vector.load %arg4[%c361, %c0_53] : memref<384x128xf32, #tpu.memory_space<vmem>>, vector<1x32xf32>
    %86 = vector.broadcast %85 : vector<1x32xf32> to vector<2x32xf32>
    %87 = arith.addf %84, %86 : vector<2x32xf32>
    %cst_54 = arith.constant 0.000000e+00 : f32
    %88 = vector.broadcast %cst_54 : f32 to vector<2x32xf32>
    %89 = arith.maximumf %87, %88 : vector<2x32xf32>
    %cst_55 = arith.constant dense<0.000000e+00> : vector<32x32xf32>
    %90 = tpu.matmul %3, %74, %cst_55 {dimension_numbers = #tpu.dot_dimension_numbers<[1], [0], [0], [1], [0, 0, 1, 1], [], []>} : vector<32x32xf32>, vector<32x32xf32>, vector<32x32xf32> -> vector<32x32xf32>
    %c64_56 = arith.constant 64 : index
    %c0_57 = arith.constant 0 : index
    %91 = vector.load %arg4[%c64_56, %c0_57] : memref<384x128xf32, #tpu.memory_space<vmem>>, vector<32x32xf32>
    %cst_58 = arith.constant dense<0.000000e+00> : vector<32x32xf32>
    %92 = tpu.matmul %90, %91, %cst_58 {dimension_numbers = #tpu.dot_dimension_numbers<[1], [0], [0], [1], [0, 0, 1, 1], [], []>} : vector<32x32xf32>, vector<32x32xf32>, vector<32x32xf32> -> vector<32x32xf32>
    %c364 = arith.constant 364 : index
    %c0_59 = arith.constant 0 : index
    %93 = vector.load %arg4[%c364, %c0_59] : memref<384x128xf32, #tpu.memory_space<vmem>>, vector<1x32xf32>
    %94 = vector.broadcast %93 : vector<1x32xf32> to vector<32x32xf32>
    %95 = arith.addf %92, %94 : vector<32x32xf32>
    %cst_60 = arith.constant 0.000000e+00 : f32
    %96 = vector.broadcast %cst_60 : f32 to vector<32x32xf32>
    %97 = arith.maximumf %95, %96 : vector<32x32xf32>
    %c64_61 = arith.constant 64 : index
    %c32_62 = arith.constant 32 : index
    %98 = vector.load %arg4[%c64_61, %c32_62] : memref<384x128xf32, #tpu.memory_space<vmem>>, vector<32x32xf32>
    %cst_63 = arith.constant dense<0.000000e+00> : vector<32x32xf32>
    %99 = tpu.matmul %97, %98, %cst_63 {dimension_numbers = #tpu.dot_dimension_numbers<[1], [0], [0], [1], [0, 0, 1, 1], [], []>} : vector<32x32xf32>, vector<32x32xf32>, vector<32x32xf32> -> vector<32x32xf32>
    %c365 = arith.constant 365 : index
    %c0_64 = arith.constant 0 : index
    %100 = vector.load %arg4[%c365, %c0_64] : memref<384x128xf32, #tpu.memory_space<vmem>>, vector<1x32xf32>
    %101 = vector.broadcast %100 : vector<1x32xf32> to vector<32x32xf32>
    %102 = arith.addf %99, %101 : vector<32x32xf32>
    %cst_65 = arith.constant dense<0.000000e+00> : vector<32xf32>
    %103 = vector.multi_reduction <add>, %102, %cst_65 [1] : vector<32x32xf32> to vector<32xf32>
    %104 = vector.shape_cast %103 : vector<32xf32> to vector<32x1xf32>
    %cst_66 = arith.constant 3.200000e+01 : f32
    %105 = vector.broadcast %cst_66 : f32 to vector<32x1xf32>
    %106 = arith.divf %104, %105 : vector<32x1xf32>
    %107 = vector.broadcast %106 : vector<32x1xf32> to vector<32x32xf32>
    %108 = arith.subf %102, %107 : vector<32x32xf32>
    %109 = arith.mulf %108, %108 : vector<32x32xf32>
    %cst_67 = arith.constant dense<0.000000e+00> : vector<32xf32>
    %110 = vector.multi_reduction <add>, %109, %cst_67 [1] : vector<32x32xf32> to vector<32xf32>
    %111 = vector.shape_cast %110 : vector<32xf32> to vector<32x1xf32>
    %cst_68 = arith.constant 3.200000e+01 : f32
    %112 = vector.broadcast %cst_68 : f32 to vector<32x1xf32>
    %113 = arith.divf %111, %112 : vector<32x1xf32>
    %114 = vector.broadcast %106 : vector<32x1xf32> to vector<32x32xf32>
    %115 = arith.subf %102, %114 : vector<32x32xf32>
    %cst_69 = arith.constant 9.99999974E-6 : f32
    %116 = vector.broadcast %cst_69 : f32 to vector<32x1xf32>
    %117 = arith.addf %113, %116 : vector<32x1xf32>
    %118 = math.rsqrt %117 : vector<32x1xf32>
    %119 = vector.broadcast %118 : vector<32x1xf32> to vector<32x32xf32>
    %120 = arith.mulf %115, %119 : vector<32x32xf32>
    %c368 = arith.constant 368 : index
    %c0_70 = arith.constant 0 : index
    %121 = vector.load %arg4[%c368, %c0_70] : memref<384x128xf32, #tpu.memory_space<vmem>>, vector<1x32xf32>
    %122 = vector.broadcast %121 : vector<1x32xf32> to vector<32x32xf32>
    %123 = arith.mulf %120, %122 : vector<32x32xf32>
    %c369 = arith.constant 369 : index
    %c0_71 = arith.constant 0 : index
    %124 = vector.load %arg4[%c369, %c0_71] : memref<384x128xf32, #tpu.memory_space<vmem>>, vector<1x32xf32>
    %125 = vector.broadcast %124 : vector<1x32xf32> to vector<32x32xf32>
    %126 = arith.addf %123, %125 : vector<32x32xf32>
    %cst_72 = arith.constant 0.000000e+00 : f32
    %127 = vector.broadcast %cst_72 : f32 to vector<32x32xf32>
    %128 = arith.maximumf %126, %127 : vector<32x32xf32>
    %c64_73 = arith.constant 64 : index
    %c64_74 = arith.constant 64 : index
    %129 = vector.load %arg4[%c64_73, %c64_74] : memref<384x128xf32, #tpu.memory_space<vmem>>, vector<32x32xf32>
    %cst_75 = arith.constant dense<0.000000e+00> : vector<32x32xf32>
    %130 = tpu.matmul %128, %129, %cst_75 {dimension_numbers = #tpu.dot_dimension_numbers<[1], [0], [0], [1], [0, 0, 1, 1], [], []>} : vector<32x32xf32>, vector<32x32xf32>, vector<32x32xf32> -> vector<32x32xf32>
    %c366 = arith.constant 366 : index
    %c0_76 = arith.constant 0 : index
    %131 = vector.load %arg4[%c366, %c0_76] : memref<384x128xf32, #tpu.memory_space<vmem>>, vector<1x32xf32>
    %132 = vector.broadcast %131 : vector<1x32xf32> to vector<32x32xf32>
    %133 = arith.addf %130, %132 : vector<32x32xf32>
    %cst_77 = arith.constant 0.000000e+00 : f32
    %134 = vector.broadcast %cst_77 : f32 to vector<32x32xf32>
    %135 = arith.maximumf %133, %134 : vector<32x32xf32>
    %cst_78 = arith.constant dense<0.000000e+00> : vector<2x32xf32>
    %136 = tpu.matmul %5, %135, %cst_78 {dimension_numbers = #tpu.dot_dimension_numbers<[1], [0], [0], [1], [0, 0, 1, 1], [], []>} : vector<2x32xf32>, vector<32x32xf32>, vector<2x32xf32> -> vector<2x32xf32>
    %c64_79 = arith.constant 64 : index
    %c96_80 = arith.constant 96 : index
    %137 = vector.load %arg4[%c64_79, %c96_80] : memref<384x128xf32, #tpu.memory_space<vmem>>, vector<32x32xf32>
    %cst_81 = arith.constant dense<0.000000e+00> : vector<2x32xf32>
    %138 = tpu.matmul %136, %137, %cst_81 {dimension_numbers = #tpu.dot_dimension_numbers<[1], [0], [0], [1], [0, 0, 1, 1], [], []>} : vector<2x32xf32>, vector<32x32xf32>, vector<2x32xf32> -> vector<2x32xf32>
    %c367 = arith.constant 367 : index
    %c0_82 = arith.constant 0 : index
    %139 = vector.load %arg4[%c367, %c0_82] : memref<384x128xf32, #tpu.memory_space<vmem>>, vector<1x32xf32>
    %140 = vector.broadcast %139 : vector<1x32xf32> to vector<2x32xf32>
    %141 = arith.addf %138, %140 : vector<2x32xf32>
    %cst_83 = arith.constant 0.000000e+00 : f32
    %142 = vector.broadcast %cst_83 : f32 to vector<2x32xf32>
    %143 = arith.maximumf %141, %142 : vector<2x32xf32>
    %144 = vector.extract_strided_slice %35 {offsets = [0, 0], sizes = [1, 32], strides = [1, 1]} : vector<2x32xf32> to vector<1x32xf32>
    %145 = vector.extract_strided_slice %35 {offsets = [1, 0], sizes = [1, 32], strides = [1, 1]} : vector<2x32xf32> to vector<1x32xf32>
    %146 = arith.subf %144, %145 : vector<1x32xf32>
    %147 = arith.mulf %146, %146 : vector<1x32xf32>
    %cst_84 = arith.constant 0.000000e+00 : f32
    %148 = vector.broadcast %cst_84 : f32 to vector<1x32xf32>
    %149 = arith.subf %148, %147 : vector<1x32xf32>
    %150 = math.exp %149 : vector<1x32xf32>
    %151 = vector.extract_strided_slice %89 {offsets = [0, 0], sizes = [1, 32], strides = [1, 1]} : vector<2x32xf32> to vector<1x32xf32>
    %152 = vector.extract_strided_slice %89 {offsets = [1, 0], sizes = [1, 32], strides = [1, 1]} : vector<2x32xf32> to vector<1x32xf32>
    %153 = arith.subf %151, %152 : vector<1x32xf32>
    %154 = arith.mulf %153, %153 : vector<1x32xf32>
    %cst_85 = arith.constant 0.000000e+00 : f32
    %155 = vector.broadcast %cst_85 : f32 to vector<1x32xf32>
    %156 = arith.subf %155, %154 : vector<1x32xf32>
    %157 = math.exp %156 : vector<1x32xf32>
    %158 = vector.extract_strided_slice %143 {offsets = [0, 0], sizes = [1, 32], strides = [1, 1]} : vector<2x32xf32> to vector<1x32xf32>
    %159 = vector.extract_strided_slice %143 {offsets = [1, 0], sizes = [1, 32], strides = [1, 1]} : vector<2x32xf32> to vector<1x32xf32>
    %160 = arith.subf %158, %159 : vector<1x32xf32>
    %161 = arith.mulf %160, %160 : vector<1x32xf32>
    %cst_86 = arith.constant 0.000000e+00 : f32
    %162 = vector.broadcast %cst_86 : f32 to vector<1x32xf32>
    %163 = arith.subf %162, %161 : vector<1x32xf32>
    %164 = math.exp %163 : vector<1x32xf32>
    %165 = tpu.concatenate %150, %157, %164 in 1 : vector<1x32xf32>, vector<1x32xf32>, vector<1x32xf32> -> vector<1x96xf32>
    %c128 = arith.constant 128 : index
    %c32_87 = arith.constant 32 : index
    %166 = vector.load %arg4[%c128, %c32_87] : memref<384x128xf32, #tpu.memory_space<vmem>>, vector<96x32xf32>
    %cst_88 = arith.constant dense<0.000000e+00> : vector<1x32xf32>
    %167 = tpu.matmul %165, %166, %cst_88 {dimension_numbers = #tpu.dot_dimension_numbers<[1], [0], [0], [1], [0, 0, 1, 1], [], []>} : vector<1x96xf32>, vector<96x32xf32>, vector<1x32xf32> -> vector<1x32xf32>
    %c370 = arith.constant 370 : index
    %c0_89 = arith.constant 0 : index
    %168 = vector.load %arg4[%c370, %c0_89] : memref<384x128xf32, #tpu.memory_space<vmem>>, vector<1x32xf32>
    %169 = arith.addf %167, %168 : vector<1x32xf32>
    %cst_90 = arith.constant 0.000000e+00 : f32
    %170 = vector.broadcast %cst_90 : f32 to vector<1x32xf32>
    %171 = arith.maximumf %169, %170 : vector<1x32xf32>
    %c96_91 = arith.constant 96 : index
    %c0_92 = arith.constant 0 : index
    %172 = vector.load %arg4[%c96_91, %c0_92] : memref<384x128xf32, #tpu.memory_space<vmem>>, vector<32x32xf32>
    %cst_93 = arith.constant dense<0.000000e+00> : vector<1x32xf32>
    %173 = tpu.matmul %171, %172, %cst_93 {dimension_numbers = #tpu.dot_dimension_numbers<[1], [0], [0], [1], [0, 0, 1, 1], [], []>} : vector<1x32xf32>, vector<32x32xf32>, vector<1x32xf32> -> vector<1x32xf32>
    %c371 = arith.constant 371 : index
    %c0_94 = arith.constant 0 : index
    %174 = vector.load %arg4[%c371, %c0_94] : memref<384x128xf32, #tpu.memory_space<vmem>>, vector<1x32xf32>
    %175 = arith.addf %173, %174 : vector<1x32xf32>
    %176 = math.tanh %175 : vector<1x32xf32>
    %c96_95 = arith.constant 96 : index
    %c32_96 = arith.constant 32 : index
    %177 = vector.load %arg4[%c96_95, %c32_96] : memref<384x128xf32, #tpu.memory_space<vmem>>, vector<32x32xf32>
    %cst_97 = arith.constant dense<0.000000e+00> : vector<1x32xf32>
    %178 = tpu.matmul %176, %177, %cst_97 {dimension_numbers = #tpu.dot_dimension_numbers<[1], [0], [0], [1], [0, 0, 1, 1], [], []>} : vector<1x32xf32>, vector<32x32xf32>, vector<1x32xf32> -> vector<1x32xf32>
    %c372 = arith.constant 372 : index
    %c0_98 = arith.constant 0 : index
    %179 = vector.load %arg4[%c372, %c0_98] : memref<384x128xf32, #tpu.memory_space<vmem>>, vector<1x32xf32>
    %180 = arith.addf %178, %179 : vector<1x32xf32>
    %cst_99 = arith.constant 0.000000e+00 : f32
    %181 = vector.broadcast %cst_99 : f32 to vector<1x32xf32>
    %182 = arith.maximumf %180, %181 : vector<1x32xf32>
    %c96_100 = arith.constant 96 : index
    %c64_101 = arith.constant 64 : index
    %183 = vector.load %arg4[%c96_100, %c64_101] : memref<384x128xf32, #tpu.memory_space<vmem>>, vector<32x32xf32>
    %cst_102 = arith.constant dense<0.000000e+00> : vector<1x32xf32>
    %184 = tpu.matmul %182, %183, %cst_102 {dimension_numbers = #tpu.dot_dimension_numbers<[1], [0], [0], [1], [0, 0, 1, 1], [], []>} : vector<1x32xf32>, vector<32x32xf32>, vector<1x32xf32> -> vector<1x32xf32>
    %185 = vector.extract_strided_slice %184 {offsets = [0, 0], sizes = [1, 1], strides = [1, 1]} : vector<1x32xf32> to vector<1x1xf32>
    %c373 = arith.constant 373 : index
    %c0_103 = arith.constant 0 : index
    %186 = vector.load %arg4[%c373, %c0_103] : memref<384x128xf32, #tpu.memory_space<vmem>>, vector<1x32xf32>
    %187 = vector.extract_strided_slice %186 {offsets = [0, 0], sizes = [1, 1], strides = [1, 1]} : vector<1x32xf32> to vector<1x1xf32>
    %188 = arith.addf %185, %187 : vector<1x1xf32>
    %189 = arith.negf %188 : vector<1x1xf32>
    %190 = math.exp %189 : vector<1x1xf32>
    %cst_104 = arith.constant 1.000000e+00 : f32
    %191 = vector.broadcast %cst_104 : f32 to vector<1x1xf32>
    %192 = arith.addf %191, %190 : vector<1x1xf32>
    %193 = arith.divf %191, %192 : vector<1x1xf32>
    %194 = vector.extract_strided_slice %143 {offsets = [0, 0], sizes = [1, 32], strides = [1, 1]} : vector<2x32xf32> to vector<1x32xf32>
    %195 = vector.extract_strided_slice %143 {offsets = [1, 0], sizes = [1, 32], strides = [1, 1]} : vector<2x32xf32> to vector<1x32xf32>
    %c224 = arith.constant 224 : index
    %c0_105 = arith.constant 0 : index
    %196 = vector.load %arg4[%c224, %c0_105] : memref<384x128xf32, #tpu.memory_space<vmem>>, vector<32x128xf32>
    %cst_106 = arith.constant dense<0.000000e+00> : vector<1x128xf32>
    %197 = tpu.matmul %194, %196, %cst_106 {dimension_numbers = #tpu.dot_dimension_numbers<[1], [0], [0], [1], [0, 0, 1, 1], [], []>} : vector<1x32xf32>, vector<32x128xf32>, vector<1x128xf32> -> vector<1x128xf32>
    %c256 = arith.constant 256 : index
    %c0_107 = arith.constant 0 : index
    %198 = vector.load %arg4[%c256, %c0_107] : memref<384x128xf32, #tpu.memory_space<vmem>>, vector<32x128xf32>
    %cst_108 = arith.constant dense<0.000000e+00> : vector<1x128xf32>
    %199 = tpu.matmul %194, %198, %cst_108 {dimension_numbers = #tpu.dot_dimension_numbers<[1], [0], [0], [1], [0, 0, 1, 1], [], []>} : vector<1x32xf32>, vector<32x128xf32>, vector<1x128xf32> -> vector<1x128xf32>
    %c288 = arith.constant 288 : index
    %c0_109 = arith.constant 0 : index
    %200 = vector.load %arg4[%c288, %c0_109] : memref<384x128xf32, #tpu.memory_space<vmem>>, vector<32x128xf32>
    %cst_110 = arith.constant dense<0.000000e+00> : vector<1x128xf32>
    %201 = tpu.matmul %194, %200, %cst_110 {dimension_numbers = #tpu.dot_dimension_numbers<[1], [0], [0], [1], [0, 0, 1, 1], [], []>} : vector<1x32xf32>, vector<32x128xf32>, vector<1x128xf32> -> vector<1x128xf32>
    %c320 = arith.constant 320 : index
    %c0_111 = arith.constant 0 : index
    %202 = vector.load %arg4[%c320, %c0_111] : memref<384x128xf32, #tpu.memory_space<vmem>>, vector<32x128xf32>
    %cst_112 = arith.constant dense<0.000000e+00> : vector<1x128xf32>
    %203 = tpu.matmul %194, %202, %cst_112 {dimension_numbers = #tpu.dot_dimension_numbers<[1], [0], [0], [1], [0, 0, 1, 1], [], []>} : vector<1x32xf32>, vector<32x128xf32>, vector<1x128xf32> -> vector<1x128xf32>
    %204 = tpu.concatenate %197, %199, %201, %203 in 1 : vector<1x128xf32>, vector<1x128xf32>, vector<1x128xf32>, vector<1x128xf32> -> vector<1x512xf32>
    %205 = tpu.concatenate %195, %195, %195, %195, %195, %195, %195, %195, %195, %195, %195, %195, %195, %195, %195, %195 in 1 : vector<1x32xf32>, vector<1x32xf32>, vector<1x32xf32>, vector<1x32xf32>, vector<1x32xf32>, vector<1x32xf32>, vector<1x32xf32>, vector<1x32xf32>, vector<1x32xf32>, vector<1x32xf32>, vector<1x32xf32>, vector<1x32xf32>, vector<1x32xf32>, vector<1x32xf32>, vector<1x32xf32>, vector<1x32xf32> -> vector<1x512xf32>
    %206 = arith.mulf %204, %205 : vector<1x512xf32>
    %207 = vector.extract_strided_slice %206 {offsets = [0, 0], sizes = [1, 32], strides = [1, 1]} : vector<1x512xf32> to vector<1x32xf32>
    %cst_113 = arith.constant dense<0.000000e+00> : vector<1xf32>
    %208 = vector.multi_reduction <add>, %207, %cst_113 [1] : vector<1x32xf32> to vector<1xf32>
    %209 = vector.shape_cast %208 : vector<1xf32> to vector<1x1xf32>
    %210 = vector.extract_strided_slice %206 {offsets = [0, 32], sizes = [1, 32], strides = [1, 1]} : vector<1x512xf32> to vector<1x32xf32>
    %cst_114 = arith.constant dense<0.000000e+00> : vector<1xf32>
    %211 = vector.multi_reduction <add>, %210, %cst_114 [1] : vector<1x32xf32> to vector<1xf32>
    %212 = vector.shape_cast %211 : vector<1xf32> to vector<1x1xf32>
    %213 = vector.extract_strided_slice %206 {offsets = [0, 64], sizes = [1, 32], strides = [1, 1]} : vector<1x512xf32> to vector<1x32xf32>
    %cst_115 = arith.constant dense<0.000000e+00> : vector<1xf32>
    %214 = vector.multi_reduction <add>, %213, %cst_115 [1] : vector<1x32xf32> to vector<1xf32>
    %215 = vector.shape_cast %214 : vector<1xf32> to vector<1x1xf32>
    %216 = vector.extract_strided_slice %206 {offsets = [0, 96], sizes = [1, 32], strides = [1, 1]} : vector<1x512xf32> to vector<1x32xf32>
    %cst_116 = arith.constant dense<0.000000e+00> : vector<1xf32>
    %217 = vector.multi_reduction <add>, %216, %cst_116 [1] : vector<1x32xf32> to vector<1xf32>
    %218 = vector.shape_cast %217 : vector<1xf32> to vector<1x1xf32>
    %219 = vector.extract_strided_slice %206 {offsets = [0, 128], sizes = [1, 32], strides = [1, 1]} : vector<1x512xf32> to vector<1x32xf32>
    %cst_117 = arith.constant dense<0.000000e+00> : vector<1xf32>
    %220 = vector.multi_reduction <add>, %219, %cst_117 [1] : vector<1x32xf32> to vector<1xf32>
    %221 = vector.shape_cast %220 : vector<1xf32> to vector<1x1xf32>
    %222 = vector.extract_strided_slice %206 {offsets = [0, 160], sizes = [1, 32], strides = [1, 1]} : vector<1x512xf32> to vector<1x32xf32>
    %cst_118 = arith.constant dense<0.000000e+00> : vector<1xf32>
    %223 = vector.multi_reduction <add>, %222, %cst_118 [1] : vector<1x32xf32> to vector<1xf32>
    %224 = vector.shape_cast %223 : vector<1xf32> to vector<1x1xf32>
    %225 = vector.extract_strided_slice %206 {offsets = [0, 192], sizes = [1, 32], strides = [1, 1]} : vector<1x512xf32> to vector<1x32xf32>
    %cst_119 = arith.constant dense<0.000000e+00> : vector<1xf32>
    %226 = vector.multi_reduction <add>, %225, %cst_119 [1] : vector<1x32xf32> to vector<1xf32>
    %227 = vector.shape_cast %226 : vector<1xf32> to vector<1x1xf32>
    %228 = vector.extract_strided_slice %206 {offsets = [0, 224], sizes = [1, 32], strides = [1, 1]} : vector<1x512xf32> to vector<1x32xf32>
    %cst_120 = arith.constant dense<0.000000e+00> : vector<1xf32>
    %229 = vector.multi_reduction <add>, %228, %cst_120 [1] : vector<1x32xf32> to vector<1xf32>
    %230 = vector.shape_cast %229 : vector<1xf32> to vector<1x1xf32>
    %231 = vector.extract_strided_slice %206 {offsets = [0, 256], sizes = [1, 32], strides = [1, 1]} : vector<1x512xf32> to vector<1x32xf32>
    %cst_121 = arith.constant dense<0.000000e+00> : vector<1xf32>
    %232 = vector.multi_reduction <add>, %231, %cst_121 [1] : vector<1x32xf32> to vector<1xf32>
    %233 = vector.shape_cast %232 : vector<1xf32> to vector<1x1xf32>
    %234 = vector.extract_strided_slice %206 {offsets = [0, 288], sizes = [1, 32], strides = [1, 1]} : vector<1x512xf32> to vector<1x32xf32>
    %cst_122 = arith.constant dense<0.000000e+00> : vector<1xf32>
    %235 = vector.multi_reduction <add>, %234, %cst_122 [1] : vector<1x32xf32> to vector<1xf32>
    %236 = vector.shape_cast %235 : vector<1xf32> to vector<1x1xf32>
    %237 = vector.extract_strided_slice %206 {offsets = [0, 320], sizes = [1, 32], strides = [1, 1]} : vector<1x512xf32> to vector<1x32xf32>
    %cst_123 = arith.constant dense<0.000000e+00> : vector<1xf32>
    %238 = vector.multi_reduction <add>, %237, %cst_123 [1] : vector<1x32xf32> to vector<1xf32>
    %239 = vector.shape_cast %238 : vector<1xf32> to vector<1x1xf32>
    %240 = vector.extract_strided_slice %206 {offsets = [0, 352], sizes = [1, 32], strides = [1, 1]} : vector<1x512xf32> to vector<1x32xf32>
    %cst_124 = arith.constant dense<0.000000e+00> : vector<1xf32>
    %241 = vector.multi_reduction <add>, %240, %cst_124 [1] : vector<1x32xf32> to vector<1xf32>
    %242 = vector.shape_cast %241 : vector<1xf32> to vector<1x1xf32>
    %243 = vector.extract_strided_slice %206 {offsets = [0, 384], sizes = [1, 32], strides = [1, 1]} : vector<1x512xf32> to vector<1x32xf32>
    %cst_125 = arith.constant dense<0.000000e+00> : vector<1xf32>
    %244 = vector.multi_reduction <add>, %243, %cst_125 [1] : vector<1x32xf32> to vector<1xf32>
    %245 = vector.shape_cast %244 : vector<1xf32> to vector<1x1xf32>
    %246 = vector.extract_strided_slice %206 {offsets = [0, 416], sizes = [1, 32], strides = [1, 1]} : vector<1x512xf32> to vector<1x32xf32>
    %cst_126 = arith.constant dense<0.000000e+00> : vector<1xf32>
    %247 = vector.multi_reduction <add>, %246, %cst_126 [1] : vector<1x32xf32> to vector<1xf32>
    %248 = vector.shape_cast %247 : vector<1xf32> to vector<1x1xf32>
    %249 = vector.extract_strided_slice %206 {offsets = [0, 448], sizes = [1, 32], strides = [1, 1]} : vector<1x512xf32> to vector<1x32xf32>
    %cst_127 = arith.constant dense<0.000000e+00> : vector<1xf32>
    %250 = vector.multi_reduction <add>, %249, %cst_127 [1] : vector<1x32xf32> to vector<1xf32>
    %251 = vector.shape_cast %250 : vector<1xf32> to vector<1x1xf32>
    %252 = vector.extract_strided_slice %206 {offsets = [0, 480], sizes = [1, 32], strides = [1, 1]} : vector<1x512xf32> to vector<1x32xf32>
    %cst_128 = arith.constant dense<0.000000e+00> : vector<1xf32>
    %253 = vector.multi_reduction <add>, %252, %cst_128 [1] : vector<1x32xf32> to vector<1xf32>
    %254 = vector.shape_cast %253 : vector<1xf32> to vector<1x1xf32>
    %cst_129 = arith.constant 0.000000e+00 : f32
    %255 = vector.broadcast %cst_129 : f32 to vector<1x16xf32>
    %256 = tpu.concatenate %209, %212, %215, %218, %221, %224, %227, %230, %233, %236, %239, %242, %245, %248, %251, %254 in 1 : vector<1x1xf32>, vector<1x1xf32>, vector<1x1xf32>, vector<1x1xf32>, vector<1x1xf32>, vector<1x1xf32>, vector<1x1xf32>, vector<1x1xf32>, vector<1x1xf32>, vector<1x1xf32>, vector<1x1xf32>, vector<1x1xf32>, vector<1x1xf32>, vector<1x1xf32>, vector<1x1xf32>, vector<1x1xf32> -> vector<1x16xf32>
    %257 = tpu.concatenate %256, %255 in 1 : vector<1x16xf32>, vector<1x16xf32> -> vector<1x32xf32>
    %258 = tpu.concatenate %194, %195 in 1 : vector<1x32xf32>, vector<1x32xf32> -> vector<1x64xf32>
    %c128_130 = arith.constant 128 : index
    %c64_131 = arith.constant 64 : index
    %259 = vector.load %arg4[%c128_130, %c64_131] : memref<384x128xf32, #tpu.memory_space<vmem>>, vector<64x32xf32>
    %cst_132 = arith.constant dense<0.000000e+00> : vector<1x32xf32>
    %260 = tpu.matmul %258, %259, %cst_132 {dimension_numbers = #tpu.dot_dimension_numbers<[1], [0], [0], [1], [0, 0, 1, 1], [], []>} : vector<1x64xf32>, vector<64x32xf32>, vector<1x32xf32> -> vector<1x32xf32>
    %261 = arith.addf %257, %260 : vector<1x32xf32>
    %c374 = arith.constant 374 : index
    %c0_133 = arith.constant 0 : index
    %262 = vector.load %arg4[%c374, %c0_133] : memref<384x128xf32, #tpu.memory_space<vmem>>, vector<1x32xf32>
    %263 = arith.addf %261, %262 : vector<1x32xf32>
    %cst_134 = arith.constant 0.000000e+00 : f32
    %264 = vector.broadcast %cst_134 : f32 to vector<1x32xf32>
    %265 = arith.maximumf %263, %264 : vector<1x32xf32>
    %c96_135 = arith.constant 96 : index
    %c96_136 = arith.constant 96 : index
    %266 = vector.load %arg4[%c96_135, %c96_136] : memref<384x128xf32, #tpu.memory_space<vmem>>, vector<32x32xf32>
    %cst_137 = arith.constant dense<0.000000e+00> : vector<1x32xf32>
    %267 = tpu.matmul %265, %266, %cst_137 {dimension_numbers = #tpu.dot_dimension_numbers<[1], [0], [0], [1], [0, 0, 1, 1], [], []>} : vector<1x32xf32>, vector<32x32xf32>, vector<1x32xf32> -> vector<1x32xf32>
    %c375 = arith.constant 375 : index
    %c0_138 = arith.constant 0 : index
    %268 = vector.load %arg4[%c375, %c0_138] : memref<384x128xf32, #tpu.memory_space<vmem>>, vector<1x32xf32>
    %269 = arith.addf %267, %268 : vector<1x32xf32>
    %cst_139 = arith.constant 0.000000e+00 : f32
    %270 = vector.broadcast %cst_139 : f32 to vector<1x32xf32>
    %271 = arith.maximumf %269, %270 : vector<1x32xf32>
    %c128_140 = arith.constant 128 : index
    %c0_141 = arith.constant 0 : index
    %272 = vector.load %arg4[%c128_140, %c0_141] : memref<384x128xf32, #tpu.memory_space<vmem>>, vector<32x32xf32>
    %cst_142 = arith.constant dense<0.000000e+00> : vector<1x32xf32>
    %273 = tpu.matmul %271, %272, %cst_142 {dimension_numbers = #tpu.dot_dimension_numbers<[1], [0], [0], [1], [0, 0, 1, 1], [], []>} : vector<1x32xf32>, vector<32x32xf32>, vector<1x32xf32> -> vector<1x32xf32>
    %274 = vector.extract_strided_slice %273 {offsets = [0, 0], sizes = [1, 1], strides = [1, 1]} : vector<1x32xf32> to vector<1x1xf32>
    %c376 = arith.constant 376 : index
    %c0_143 = arith.constant 0 : index
    %275 = vector.load %arg4[%c376, %c0_143] : memref<384x128xf32, #tpu.memory_space<vmem>>, vector<1x32xf32>
    %276 = vector.extract_strided_slice %275 {offsets = [0, 0], sizes = [1, 1], strides = [1, 1]} : vector<1x32xf32> to vector<1x1xf32>
    %277 = arith.addf %274, %276 : vector<1x1xf32>
    %278 = arith.negf %277 : vector<1x1xf32>
    %279 = math.exp %278 : vector<1x1xf32>
    %cst_144 = arith.constant 1.000000e+00 : f32
    %280 = vector.broadcast %cst_144 : f32 to vector<1x1xf32>
    %281 = arith.addf %280, %279 : vector<1x1xf32>
    %282 = arith.divf %280, %281 : vector<1x1xf32>
    %c377 = arith.constant 377 : index
    %c0_145 = arith.constant 0 : index
    %283 = vector.load %arg4[%c377, %c0_145] : memref<384x128xf32, #tpu.memory_space<vmem>>, vector<1x32xf32>
    %284 = vector.extract_strided_slice %283 {offsets = [0, 0], sizes = [1, 1], strides = [1, 1]} : vector<1x32xf32> to vector<1x1xf32>
    %285 = arith.mulf %284, %193 : vector<1x1xf32>
    %c378 = arith.constant 378 : index
    %c0_146 = arith.constant 0 : index
    %286 = vector.load %arg4[%c378, %c0_146] : memref<384x128xf32, #tpu.memory_space<vmem>>, vector<1x32xf32>
    %287 = vector.extract_strided_slice %286 {offsets = [0, 0], sizes = [1, 1], strides = [1, 1]} : vector<1x32xf32> to vector<1x1xf32>
    %288 = arith.mulf %287, %282 : vector<1x1xf32>
    %289 = arith.addf %285, %288 : vector<1x1xf32>
    %cst_147 = arith.constant 0.000000e+00 : f32
    %290 = vector.broadcast %cst_147 : f32 to vector<1x1xf32>
    %cst_148 = arith.constant 0.000000e+00 : f32
    %291 = vector.broadcast %cst_148 : f32 to vector<1x126xf32>
    %292 = tpu.concatenate %289, %290, %291 in 1 : vector<1x1xf32>, vector<1x1xf32>, vector<1x126xf32> -> vector<1x128xf32>
    %cst_149 = arith.constant 0.000000e+00 : f32
    %293 = vector.broadcast %cst_149 : f32 to vector<7x128xf32>
    %294 = tpu.concatenate %292, %293 in 0 : vector<1x128xf32>, vector<7x128xf32> -> vector<8x128xf32>
    %c0_150 = arith.constant 0 : index
    %c0_151 = arith.constant 0 : index
    %c0_152 = arith.constant 0 : index
    %295 = vector.load %arg5[%c0_150, %c0_151, %c0_152] : memref<1x8x128xf32, #tpu.memory_space<vmem>>, vector<1x8x128xf32>
    %296 = vector.shape_cast %295 : vector<1x8x128xf32> to vector<8x128xf32>
    %297 = vector.shape_cast %294 : vector<8x128xf32> to vector<1x8x128xf32>
    tpu.vector_store %arg5[%c0_150, %c0_151, %c0_152], %297 {strides = array<i32>} : memref<1x8x128xf32, #tpu.memory_space<vmem>>, vector<1x8x128xf32>,
    return
  }
  func.func @transform_0(%arg0: i32) -> (i32, i32, i32) {
    %c0_i32 = arith.constant 0 : i32
    %c0_i32_0 = arith.constant 0 : i32
    %c0_i32_1 = arith.constant 0 : i32
    return %arg0, %c0_i32, %c0_i32_0 : i32, i32, i32
  }
  func.func @transform_1(%arg0: i32) -> (i32, i32, i32) {
    %c0_i32 = arith.constant 0 : i32
    %c0_i32_0 = arith.constant 0 : i32
    %c0_i32_1 = arith.constant 0 : i32
    return %arg0, %c0_i32, %c0_i32_0 : i32, i32, i32
  }
  func.func @transform_2(%arg0: i32) -> (i32, i32, i32) {
    %c0_i32 = arith.constant 0 : i32
    %c0_i32_0 = arith.constant 0 : i32
    %c0_i32_1 = arith.constant 0 : i32
    return %arg0, %c0_i32, %c0_i32_0 : i32, i32, i32
  }
  func.func @transform_3(%arg0: i32) -> (i32, i32) {
    %c0_i32 = arith.constant 0 : i32
    %c0_i32_0 = arith.constant 0 : i32
    %c0_i32_1 = arith.constant 0 : i32
    return %c0_i32, %c0_i32_0 : i32, i32
  }
  func.func @transform_4(%arg0: i32) -> (i32, i32, i32) {
    %c0_i32 = arith.constant 0 : i32
    %c0_i32_0 = arith.constant 0 : i32
    %c0_i32_1 = arith.constant 0 : i32
    return %arg0, %c0_i32, %c0_i32_0 : i32, i32, i32
  }
}

</mosaic_0001>

<bundles_post_ra>
// kernel: tpu_custom_call.1
= control target key start
LH: loop header
LB: loop body
LE: loop exit
PB: predicated region body
PF: predicated region fallthrough
CT: control target
= control target key end

     0   :  { %s3275_s0 = inlined_call_operand.hbm [shape: f32[4,32,32], index: 0, kind: input, shape index: {}]   ;;  %s3276_s1 = inlined_call_operand.hbm [shape: f32[4,32,32], index: 1, kind: input, shape index: {}]   ;;  %s3277_s2 = inlined_call_operand.hbm [shape: f32[4,2,32], index: 2, kind: input, shape index: {}]   ;;  %s3278_s3 = inlined_call_operand.hbm [shape: f32[384,128], index: 3, kind: input, shape index: {}]   ;;  %s3279_s4 = inlined_call_operand.hbm [shape: f32[4,8,128], index: 4, kind: output, shape index: {}]  }
   0x1   :  { %3282 = sst [smem:[#allocation16_spill]] %s3276_s1 }
   0x2   :  { %3283 = sst [smem:[#allocation17_spill]] %s3278_s3 }
   0x3   :  { %9 = vsyncpa [#allocation3], 0 }
   0x4   :  { %11 = vsyncpa [#allocation3 + $0x1], 0 }
   0x5   :  { %12 = vsyncpa [#allocation6], 0 }
   0x6   :  { %14 = vsyncpa [#allocation6 + $0x1], 0 }
   0x7   :  { %15 = vsyncpa [#allocation9], 0 }
   0x8   :  { %16 = vsyncpa [#allocation4], 0 }
   0x9   :  { %18 = vsyncpa [#allocation4 + $0x1], 0  ;;  %s2727_s15 = smov 0   ;;  %s2729_s16 = smov 0  }
   0xa   :  { %s2731_s17 = smov 0   ;;  %s2733_s18 = smov 0  }
   0xb LB: > { %s2748_s19 = sadd.s32 1, %s2693_s18   ;;  %s31_s20 = sadd.s32 1, %s2689_s17  ;;  %s2693_s18 = sphi %s2733_s18, %s3299_s18   ;;  %s2689_s17 = sphi %s2731_s17, %s3298_s17   ;;  %s2685_s16 = sphi %s2729_s16, %s3297_s16   ;;  %s2681_s15 = sphi %s2727_s15, %s3296_s15  }
   0xc   : > { %s28_s21 = ssub.s32 %s2693_s18, %s2748_s19  ;;  %p38_p0 = scmp.ne.s32.totalorder %s2689_s17, %s2685_s16 }
   0xd   : > { %p29_p1 = scmp.eq.s32.totalorder %s28_s21, 0  ;;  %p39_p2 = scmp.eq.s32.totalorder %s2693_s18, 0 }
   0xe   : > { %p2237_p4 = scmp.lt.s32.totalorder %s2693_s18, 4  ;;  %s2764_s23 = sand.u32 1, %s2689_s17  }
   0xf   : > { %s2757_s22 = scalar_select %p29_p1, %s2689_s17, %s31_s20  }
  0x10   : > { %p40_p3 = por %p39_p2, %p38_p0  ;;  %s2119_s24 = sshll.u32 %s2764_s23, 5 }
  0x11   : > { %3284 = sst [smem:[#allocation15_spill]] %s2757_s22  ;;  %s2204_s25 = sshll.u32 %s2693_s18, 5 }
  0x12   : > { %p2768_p5 = pnand %p2237_p4, %p40_p3  ;;  %s203_s27 = sand.u32 1, %s2693_s18  }
  0x13   : > { %s3286_s1 = sld [smem:[#allocation16_spill]]  ;;  %s207_s6 = scalar_lea.vmem [#allocation5], %s2119_s24 }
  0x14   : > { %s215_s7 = sshll.u32 %s207_s6, 4  ;;  %s2780_s8 = scalar_lea.sflag [#allocation6], %s203_s27  ;;  %s216_s7 = int_to_ptr.vmem [resolvable:$true] %s215_s7 }
  0x15   : > { %p2503_p7 = pneg %p2768_p5 }
  0x19   : > { %s212_s30 = scalar_lea.hbm %s3286_s1, %s2204_s25  ;;  %s2506_s13 = scalar_lea.hbm %s3286_s1, 128 }
  0x1a   : > { %s213_s5 = sshll.u32 %s212_s30, 4  ;;  %s214_s5 = int_to_ptr.hbm [resolvable:$true] %s213_s5 }
  0x1b   : > { %s2499_s9 = sshra.s32 %s214_s5, 4  ;;  %s2500_s9 = int_to_ptr.hbm [resolvable:$true] %s2499_s9 }
  0x1c   : > { %s2501_s10 = scalar_lea.hbm %s2500_s9, 32  ;;  %p2507_p10 = scmp.lt.s32.totalorder %s2500_s9, %s3286_s1 }
  0x1d   : > { %p2502_p6 = scmp.ne.s32.totalorder %s2500_s9, %s2501_s10  ;;  %p2508_p11 = scmp.lt.s32.totalorder %s2506_s13, %s2501_s10 }
  0x1f   : > { %p2504_p8 = pnand %p2503_p7, %p2502_p6  ;;  %p2509_p12 = por %p2508_p11, %p2507_p10 }
  0x21   : > { %p2505_p9 = pneg %p2504_p8 }
  0x23   : > { %p2510_p13 = pnand %p2509_p12, %p2505_p9 }
  0x25   : > { %2513 = shalt.err (!%p2510_p13)
}
  0x26   : > { %s3280_s21 = smov 128   ;;  %s2696_s27 = smov 8  }
  0x27   : > { %2228 = dma.hbm_to_vmem [thread:$0]  (!%p2768_p5), %s214_s5, 512, %s216_s7, %s2780_s8, %s3280_s21, %s3280_s21, %s2696_s27  }
  0x28   : > { %s2800_s28 = sadd.s32 4294967295, %s2693_s18   ;;  %s2115_s29 = sadd.s32 4294967294, %s2693_s18  }
  0x29   : > { %p44_p1 = scmp.ne.s32.totalorder %s2685_s16, %s2681_s15  ;;  %p45_p2 = scmp.eq.s32.totalorder %s2800_s28, 0 }
  0x2a   : > { %p141_p3 = scmp.eq.s32.totalorder %s2800_s28, 3  ;;  %p147_p4 = scmp.eq.s32.totalorder %s2115_s29, 3 }
  0x2b   : > { %p2809_p6 = por %p45_p2, %p44_p1  ;;  %p2116_p8 = scmp.ge.s32.totalorder %s2693_s18, 1 }
  0x2c   : > { %p2817_p9 = por %p141_p3, %p38_p0  ;;  %p2821_p10 = por %p147_p4, %p44_p1 }
  0x2d   : > { %p154_p11 = scmp.lt.s32.totalorder %s2693_s18, 5  ;;  %s3290_s3 = sld [smem:[#allocation17_spill]] }
  0x2e   : > { %s2697_s12 = smov [#allocation8]   ;;  %s190_s29 = scalar_lea.hbm %s3275_s0, %s2204_s25 }
  0x2f   : > { %p2829_p12 = pnand %p2116_p8, %p154_p11  ;;  %s167_s13 = sshll.u32 %s2697_s12, 4  ;;  %s168_s13 = int_to_ptr.vmem [resolvable:$true] %s167_s13 }
  0x30   : > { %s191_s7 = sshll.u32 %s190_s29, 4  ;;  %s185_s9 = scalar_lea.vmem [#allocation2], %s2119_s24  ;;  %s192_s7 = int_to_ptr.hbm [resolvable:$true] %s191_s7 }
  0x31   : > { %p2218_p0 = pneg %p2829_p12  ;;  %s193_s21 = sshll.u32 %s185_s9, 4  ;;  %s194_s21 = int_to_ptr.vmem [resolvable:$true] %s193_s21 }
  0x32   : > { %s3292_s1 = smov 128   ;;  %s182_s12 = scalar_lea.sflag [#allocation3], %s2764_s23 }
  0x33   : > { %s165_s10 = sshll.u32 %s3290_s3, 4  ;;  %p2219_p13 = pnand %p2218_p0, %p45_p2  ;;  %s166_s10 = int_to_ptr.hbm [resolvable:$true] %s165_s10 }
  0x34   : > { %s2559_s3 = sshra.s32 %s192_s7, 4  ;;  %s2566_s20 = scalar_lea.hbm %s3275_s0, 128  ;;  %s2560_s3 = int_to_ptr.hbm [resolvable:$true] %s2559_s3 }
  0x35   : > { %2221 = dma.hbm_to_vmem [thread:$0]  (!%p2219_p13), %s166_s10, 6144, %s168_s13, [#allocation9], %s3292_s1, %s3292_s1, %s2696_s27  }
  0x36   : > { %s2561_s22 = scalar_lea.hbm %s2560_s3, 32  ;;  %p2567_p8 = scmp.lt.s32.totalorder %s2560_s3, %s3275_s0 }
  0x37   : > { %p2562_p1 = scmp.ne.s32.totalorder %s2560_s3, %s2561_s22  ;;  %p2568_p11 = scmp.lt.s32.totalorder %s2566_s20, %s2561_s22 }
  0x39   : > { %p2564_p3 = pnand %p2562_p1, %p2503_p7  ;;  %p2569_p0 = por %p2568_p11, %p2567_p8 }
  0x3b   : > { %p2565_p4 = pneg %p2564_p3 }
  0x3d   : > { %p2570_p13 = pnand %p2569_p0, %p2565_p4 }
  0x3f   : > { %2573 = shalt.err (!%p2570_p13)
}
  0x40   : > { %2225 = dma.hbm_to_vmem [thread:$0]  (!%p2768_p5), %s192_s7, 512, %s194_s21, %s182_s12, %s3292_s1, %s3292_s1, %s2696_s27  }
  0x41   : > { %s2125_s10 = sshll.u32 %s2764_s23, 1  ;;  %s2126_s13 = sshll.u32 %s2693_s18, 1 }
  0x42   : > { %s233_s14 = scalar_lea.hbm %s3277_s2, %s2126_s13  ;;  %s229_s22 = scalar_lea.vmem [#allocation7], %s2125_s10 }
  0x43   : > { %s235_s3 = sshll.u32 %s233_s14, 4  ;;  %s237_s20 = sshll.u32 %s229_s22, 4  ;;  %s236_s3 = int_to_ptr.hbm [resolvable:$true] %s235_s3  ;;  %s238_s20 = int_to_ptr.vmem [resolvable:$true] %s237_s20 }
  0x44   : > { %s2589_s24 = sshra.s32 %s236_s3, 4  ;;  %s2596_s21 = scalar_lea.hbm %s3277_s2, 8  ;;  %s2590_s24 = int_to_ptr.hbm [resolvable:$true] %s2589_s24 }
  0x45   : > { %s2591_s29 = scalar_lea.hbm %s2590_s24, 2  ;;  %p2597_p8 = scmp.lt.s32.totalorder %s2590_s24, %s3277_s2 }
  0x46   : > { %p2592_p1 = scmp.ne.s32.totalorder %s2590_s24, %s2591_s29  ;;  %p2598_p11 = scmp.lt.s32.totalorder %s2596_s21, %s2591_s29 }
  0x48   : > { %p2594_p3 = pnand %p2592_p1, %p2503_p7  ;;  %p2599_p0 = por %p2598_p11, %p2597_p8 }
  0x4a   : > { %p2595_p4 = pneg %p2594_p3 }
  0x4c   : > { %p2600_p13 = pnand %p2599_p0, %p2595_p4 }
  0x4e   : > { %2603 = shalt.err (!%p2600_p13)
}
  0x4f   : > { %2231 = dma.hbm_to_vmem [thread:$0]  (!%p2768_p5), %s236_s3, 32, %s238_s20, %s2780_s8  }
  0x50   : > { %246 = sbr.rel (%p2829_p12) target bundleno = 3557 (0xde5), region = 36  ;;  %s2882_s12 = sand.u32 (!%p2829_p12), 1, %s2685_s16  }
  0x51   : > { %s2128_s10 = sshll.u32 (!%p2829_p12), %s2882_s12, 5  ;;  %s249_s13 = scalar_lea.sflag (!%p2829_p12), [#allocation3], %s2882_s12 }
  0x52   : > { %s252_s9 = scalar_lea.vmem (!%p2829_p12), [#allocation2], %s2128_s10 }
  0x55   : > { %2664 = dma.done.wait (%p2809_p6), %s249_s13, 512  }
  0x56   : > { %2666 = vsyncadd (%p2809_p6), %s249_s13, 4294966784  ;;  %s258_s26 = sand.u32 1, %s2800_s28   ;;  %s262_s11 = scalar_lea.vmem [#allocation5], %s2128_s10 }
  0x57   : > { %s259_s8 = scalar_lea.sflag [#allocation6], %s258_s26 }
  0x58   : > { %2668 = dma.done.wait (%p2809_p6), %s259_s8, 544  }
  0x59   : > { %2670 = vsyncadd (%p2809_p6), %s259_s8, 4294966752  ;;  %s2130_s25 = sshll.u32 %s2882_s12, 1 }
  0x5a   : > { %s2896_s14 = scalar_lea.vmem [#allocation7], %s2130_s25 }
  0x5b   : > { %2672 = dma.done.wait (%p45_p2), [#allocation9], 6144  }
  0x5c   : > { %2674 = vsyncadd (%p45_p2), [#allocation9], 4294961152  ;;  %v316_v0 = vld [vmem:[%s252_s9 + $0x18] sm:$0xff]  ;;  %v315_v1 = vld [vmem:[%s252_s9 + $0x10] sm:$0xff]  ;;  %vm322_vm0 = vcmask 261120   ;;  %s2698_s30 = smov 96  }
  0x5d   : > { %347 = vmatpush.msra.mxu0 %v316_v0  ;;  %v314_v2 = vld [vmem:[%s252_s9 + $0x8] sm:$0xff]  ;;  %v313_v3 = vld [vmem:[%s252_s9] sm:$0xff]  ;;  %v366_v5 = vld [vmem:[#allocation8 + $0x10] sm:$0xff]  ;;  %s2699_s3 = smov 64   ;;  %s2701_s22 = smov 32  }
  0x5e   : > { %v367_v4 = vld [vmem:[#allocation8 + $0x18] sm:$0xff]  ;;  %v365_v6 = vld [vmem:[#allocation8 + $0x8] sm:$0xff]  ;;  %v364_v11 = vld [vmem:[#allocation8] sm:$0xff]  ;;  %s2132_s20 = sshll.u32 %s2882_s12, 3  ;;  %s2201_s24 = sshll.u32 %s2800_s28, 3 }
  0x5f   : > { %348 = vmatpush.msra.mxu0 %v315_v1  ;;  %394 = vmatpush.msra.mxu1 %v367_v4  ;;  %v2902_v7 = vld [vmem:[%s262_s11] sm:$0xff]  ;;  %v2906_v8 = vld [vmem:[%s262_s11 + $0x8] sm:$0xff]  ;;  %v2910_v9 = vld [vmem:[%s262_s11 + $0x10] sm:$0xff]  ;;  %v2918_v12 = vpack.i.bf16 %v366_v5, %v367_v4  ;;  %v2922_v13 = vpack.i.bf16 %v364_v11, %v365_v6  ;;  %s1987_s23 = scalar_lea.hbm %s3279_s4, %s2201_s24  ;;  %s312_s21 = scalar_lea.vmem [#allocation10], %s2132_s20 }
  0x60   : > { %v2914_v10 = vld [vmem:[%s262_s11 + $0x18] sm:$0xff]  ;;  %v2449_v24 = vld [vmem:[#allocation8 + $0x160] ss:$0 sm:$0xff]  ;;  %v2450_v43 = vld [vmem:[#allocation8 + $0x161] ss:$0 sm:$0xff]  ;;  %s1989_s27 = sshll.u32 %s312_s21, 4  ;;  %s1990_s27 = int_to_ptr.vmem [resolvable:$true] %s1989_s27 }
  0x61   : > { %349 = vmatpush.msra.mxu0 %v314_v2  ;;  %395 = vmatpush.msra.mxu1 %v366_v5  ;;  %v630_v56 = vld [vmem:[#allocation8 + $0x38] sm:$0xff]  ;;  %v629_v57 = vld [vmem:[#allocation8 + $0x30] sm:$0xff]  ;;  %v628_v58 = vld [vmem:[#allocation8 + $0x28] sm:$0xff]  ;;  %s1991_s28 = sshll.u32 %s1987_s23, 4  ;;  %s1977_s7 = scalar_lea.sflag [#allocation4], %s2882_s12  ;;  %s1992_s28 = int_to_ptr.hbm [resolvable:$true] %s1991_s28 }
  0x62   : > { %2280 = vrot.lane.b32.xlu0 %v2918_v12, %s2698_s30  ;;  %2290 = vrot.lane.b32.xlu1 %v2918_v12, %s2699_s3  ;;  %v627_v59 = vld [vmem:[#allocation8 + $0x20] sm:$0xff]  ;;  %v2950_v1 = vpack.i.bf16 %v629_v57, %v630_v56  ;;  %s2633_s10 = sshra.s32 %s1992_s28, 4  ;;  %s2639_s8 = scalar_lea.hbm %s3279_s4, 32  ;;  %s2634_s10 = int_to_ptr.hbm [resolvable:$true] %s2633_s10 }
  0x63   : > { %350 = vmatpush.msra.mxu0 %v313_v3  ;;  %396 = vmatpush.msra.mxu1 %v365_v6  ;;  %v2451_v63 = vld [vmem:[#allocation8 + $0x162] ss:$0 sm:$0xff]  ;;  %s2635_s13 = scalar_lea.hbm %s2634_s10, 8  ;;  %p2640_p6 = scmp.lt.s32.totalorder %s2634_s10, %s3279_s4 }
  0x64   : > { %2133 = vmatmul.msk.f32.vlgmr.msra.gmra.mxu0 %vm322_vm0, %v2902_v7  ;;  %2300 = vrot.lane.b32.xlu2 %v2950_v1, %s2698_s30  ;;  %p2636_p5 = scmp.ne.s32.totalorder %s2634_s10, %s2635_s13  ;;  %p2641_p12 = scmp.lt.s32.totalorder %s2639_s8, %s2635_s13 }
  0x65   : > { %397 = vmatpush.msra.mxu1 %v364_v11 }
  0x66   : > { %p2637_p7 = pnand %p2636_p5, %p2817_p9  ;;  %p2642_p1 = por %p2641_p12, %p2640_p6 }
  0x68   : > { %p2638_p2 = pneg %p2637_p7 }
  0x6a   : > { %2285 = vrot.lane.b32.xlu0 %v2922_v13, %s2698_s30  ;;  %2295 = vrot.lane.b32.xlu1 %v2922_v13, %s2699_s3  ;;  %p2643_p3 = pnand %p2642_p1, %p2638_p2 }
  0x6c   : > { %2134 = vmatmul.msk.f32.gmra.mxu0 %vm322_vm0, %v2906_v8 }
  0x74   : > { %2135 = vmatmul.msk.f32.gmra.mxu0 %vm322_vm0, %v2910_v9 }
  0x7c   : > { %2136 = vmatmul.msk.f32.gmra.mxu0 %vm322_vm0, %v2914_v10 }
  0xd4   : > { %v2281_v18 = vpop.permute.xlu0 %2280  ;;  %v2291_v37 = vpop.permute.xlu1 %2290 }
  0xd5   : > { %v2282_v19 = vunpack.i.l.bf16 %v2281_v18  ;;  %v2283_v20 = vunpack.i.h.bf16 %v2281_v18  ;;  %v2292_v38 = vunpack.i.l.bf16 %v2291_v37  ;;  %v2293_v39 = vunpack.i.h.bf16 %v2291_v37 }
  0xd7   : > { %457 = vmatpush.msra.mxu2 %v2282_v19  ;;  %516 = vmatpush.msra.mxu3 %v2292_v38 }
  0xd9   : > { %458 = vmatpush.msra.mxu2 %v2283_v20  ;;  %517 = vmatpush.msra.mxu3 %v2293_v39 }
  0xdc   : > { %v2286_v21 = vpop.permute.xlu0 %2285  ;;  %v2296_v40 = vpop.permute.xlu1 %2295 }
  0xdd   : > { %v2287_v22 = vunpack.i.l.bf16 %v2286_v21  ;;  %v2288_v23 = vunpack.i.h.bf16 %v2286_v21  ;;  %v2297_v41 = vunpack.i.l.bf16 %v2296_v40  ;;  %v2298_v42 = vunpack.i.h.bf16 %v2296_v40  ;;  %v2963_v21 = vld [vmem:[%s2896_s14] sm:$0x3] }
  0xdf   : > { %459 = vmatpush.msra.mxu2 %v2287_v22  ;;  %518 = vmatpush.msra.mxu3 %v2297_v41  ;;  %v2301_v22 = vpop.permute.xlu2 %2300 }
  0xe1   : > { %v352_v14 = vpop.f32.mrf.mxu0  ;;  %460 = vmatpush.msra.mxu2 %v2288_v23  ;;  %519 = vmatpush.msra.mxu3 %v2298_v42  ;;  %v2303_v23 = vunpack.i.h.bf16 %v2301_v22 }
  0xe2   : > { %2137 = vmatmul.msk.f32.vlgmr.msra.gmra.mxu1 %vm322_vm0, %v352_v14  ;;  %v2954_v14 = vpack.i.bf16 %v627_v59, %v628_v58 }
  0xe3   : > { %657 = vmatpush.msrb.mxu3 %v630_v56 }
  0xe4   : > { %2305 = vrot.lane.b32.xlu2 %v2954_v14, %s2698_s30 }
  0xe5   : > { %658 = vmatpush.msrb.mxu3 %v629_v57 }
  0xe7   : > { %659 = vmatpush.msrb.mxu3 %v628_v58 }
  0xe9   : > { %v355_v15 = vpop.f32.mrf.mxu0  ;;  %660 = vmatpush.msrb.mxu3 %v627_v59 }
  0xea   : > { %2138 = vmatmul.msk.f32.gmra.mxu1 %vm322_vm0, %v355_v15 }
  0xf1   : > { %v358_v16 = vpop.f32.mrf.mxu0 }
  0xf2   : > { %2139 = vmatmul.msk.f32.gmra.mxu1 %vm322_vm0, %v358_v16 }
  0xf9   : > { %v361_v17 = vpop.f32.mrf.mxu0 }
  0xfa   : > { %2140 = vmatmul.msk.f32.gmra.mxu1 %vm322_vm0, %v361_v17 }
 0x15f   : > { %v399_v25 = vpop.f32.mrf.mxu1 }
 0x160   : > { %v400_v26 = vadd.f32 %v2449_v24, %v399_v25  ;;  %v2306_v25 = vpop.permute.xlu2 %2305 }
 0x162   : > { %v411_v27 = vmax.f32 %v400_v26, 0.0  ;;  %v2308_v26 = vunpack.i.h.bf16 %v2306_v25 }
 0x164   : > { %2141 = vmatmul.msk.f32.vlgmr.msra.gmra.mxu2 %vm322_vm0, %v411_v27  ;;  %v2307_v27 = vunpack.i.l.bf16 %v2306_v25 }
 0x167   : > { %v402_v28 = vpop.f32.mrf.mxu1 }
 0x168   : > { %v403_v29 = vadd.f32 %v2449_v24, %v402_v28  ;;  %v2452_v28 = vld [vmem:[#allocation8 + $0x166] ss:$0 sm:$0xff] }
 0x16a   : > { %v412_v30 = vmax.f32 %v403_v29, 0.0 }
 0x16c   : > { %2142 = vmatmul.msk.f32.gmra.mxu2 %vm322_vm0, %v412_v30 }
 0x16f   : > { %v405_v31 = vpop.f32.mrf.mxu1 }
 0x170   : > { %v406_v32 = vadd.f32 %v2449_v24, %v405_v31 }
 0x172   : > { %v413_v33 = vmax.f32 %v406_v32, 0.0 }
 0x174   : > { %2143 = vmatmul.msk.f32.gmra.mxu2 %vm322_vm0, %v413_v33 }
 0x177   : > { %v408_v34 = vpop.f32.mrf.mxu1 }
 0x178   : > { %v409_v35 = vadd.f32 %v2449_v24, %v408_v34  ;;  %v2302_v24 = vunpack.i.l.bf16 %v2301_v22 }
 0x17a   : > { %v414_v36 = vmax.f32 %v409_v35, 0.0 }
 0x17c   : > { %2144 = vmatmul.msk.f32.gmra.mxu2 %vm322_vm0, %v414_v36 }
 0x1e7   : > { %v462_v44 = vpop.f32.mrf.mxu2 }
 0x1e8   : > { %v463_v45 = vadd.f32 %v2450_v43, %v462_v44 }
 0x1ea   : > { %v474_v46 = vmax.f32 %v463_v45, 0.0 }
 0x1ec   : > { %2145 = vmatmul.msk.f32.vlgmr.msra.gmra.mxu3 %vm322_vm0, %v474_v46 }
 0x1ef   : > { %v465_v47 = vpop.f32.mrf.mxu2 }
 0x1f0   : > { %v466_v48 = vadd.f32 %v2450_v43, %v465_v47 }
 0x1f2   : > { %v475_v49 = vmax.f32 %v466_v48, 0.0 }
 0x1f4   : > { %2146 = vmatmul.msk.f32.gmra.mxu3 %vm322_vm0, %v475_v49 }
 0x1f7   : > { %v468_v50 = vpop.f32.mrf.mxu2 }
 0x1f8   : > { %v469_v51 = vadd.f32 %v2450_v43, %v468_v50 }
 0x1fa   : > { %v476_v52 = vmax.f32 %v469_v51, 0.0 }
 0x1fc   : > { %2147 = vmatmul.msk.f32.gmra.mxu3 %vm322_vm0, %v476_v52 }
 0x1ff   : > { %v471_v53 = vpop.f32.mrf.mxu2 }
 0x200   : > { %v472_v54 = vadd.f32 %v2450_v43, %v471_v53  ;;  %v2453_v43 = vld [vmem:[#allocation8 + $0x167] ss:$0 sm:$0xff] }
 0x202   : > { %v477_v55 = vmax.f32 %v472_v54, 0.0 }
 0x204   : > { %2148 = vmatmul.msk.f32.gmra.mxu3 %vm322_vm0, %v477_v55  ;;  %610 = vmatpush.msrb.mxu2 %v477_v55  ;;  %v2700_v55 = vmov 32.0  }
 0x205   : > { %2465 = vrcp.f32 %v2700_v55 }
 0x206   : > { %611 = vmatpush.msrb.mxu2 %v476_v52 }
 0x208   : > { %612 = vmatpush.msrb.mxu2 %v475_v49 }
 0x20a   : > { %613 = vmatpush.msrb.mxu2 %v474_v46 }
 0x20b   : > { %2151 = vmatmul.msk.f32.vlgmr.msrb.gmra.mxu2 %vm322_vm0, %v2902_v7  ;;  %v2466_v56 = vpop.eup %2465 }
 0x20c   : > { %v750_v57 = vmul.f32 32.0, %v2466_v56  ;;  %vm754_vm1 = vweird.f32 %v2466_v56 }
 0x20e   : > { %v751_v58 = vsub.f32 1.0, %v750_v57 }
 0x210   : > { %v752_v59 = vmul.f32 %v2466_v56, %v751_v58 }
 0x213   : > { %2152 = vmatmul.msk.f32.gmra.mxu2 %vm322_vm0, %v2906_v8 }
 0x21b   : > { %2153 = vmatmul.msk.f32.gmra.mxu2 %vm322_vm0, %v2910_v9 }
 0x223   : > { %2154 = vmatmul.msk.f32.gmra.mxu2 %vm322_vm0, %v2914_v10 }
 0x26f   : > { %v521_v60 = vpop.f32.mrf.mxu3 }
 0x270   : > { %v522_v6 = vadd.f32 %v2451_v63, %v521_v60  ;;  %v753_v60 = vadd.f32 %v2466_v56, %v752_v59 }
 0x272   : > { %v533_v17 = vmax.f32 %v522_v6, 0.0 }
 0x277   : > { %v524_v61 = vpop.f32.mrf.mxu3 }
 0x278   : > { %v525_v4 = vadd.f32 %v2451_v63, %v524_v61  ;;  %v2977_v61 = vsel %vm754_vm1, %v2466_v56, %v753_v60 }
 0x27a   : > { %v534_v15 = vmax.f32 %v525_v4, 0.0 }
 0x27f   : > { %v527_v62 = vpop.f32.mrf.mxu3 }
 0x280   : > { %v528_v2 = vadd.f32 %v2451_v63, %v527_v62 }
 0x282   : > { %v535_v11 = vmax.f32 %v528_v2, 0.0 }
 0x287   : > { %v530_v0 = vpop.f32.mrf.mxu3 }
 0x288   : > { %v531_v3 = vadd.f32 %v2451_v63, %v530_v0 }
 0x28a   : > { %v536_v5 = vmax.f32 %v531_v3, 0.0 }
 0x28c   : > { %552 = vmatpush.msrb.mxu0 %v536_v5 }
 0x28e   : > { %553 = vmatpush.msrb.mxu0 %v535_v11  ;;  %v615_v16 = vpop.f32.mrf.mxu2 }
 0x28f   : > { %2155 = vmatmul.msk.f32.vlgmr.msrb.gmra.mxu3 %vm322_vm0, %v615_v16 }
 0x290   : > { %554 = vmatpush.msrb.mxu0 %v534_v15 }
 0x292   : > { %555 = vmatpush.msrb.mxu0 %v533_v17 }
 0x293   : > { %2149 = vmatmul.msk.f32.vlgmr.msrb.gmra.mxu0 %vm322_vm0, %v2963_v21 }
 0x294   : > { %720 = vmatpush.msra.mxu0 %v2302_v24 }
 0x296   : > { %v618_v18 = vpop.f32.mrf.mxu2  ;;  %721 = vmatpush.msra.mxu0 %v2303_v23 }
 0x297   : > { %2156 = vmatmul.msk.f32.gmra.mxu3 %vm322_vm0, %v618_v18 }
 0x298   : > { %722 = vmatpush.msra.mxu0 %v2307_v27 }
 0x29a   : > { %723 = vmatpush.msra.mxu0 %v2308_v26 }
 0x29e   : > { %v621_v19 = vpop.f32.mrf.mxu2 }
 0x29f   : > { %2157 = vmatmul.msk.f32.gmra.mxu3 %vm322_vm0, %v621_v19 }
 0x2a6   : > { %v624_v20 = vpop.f32.mrf.mxu2 }
 0x2a7   : > { %2158 = vmatmul.msk.f32.gmra.mxu3 %vm322_vm0, %v624_v20 }
 0x310   : > { %v2971_v41 = vpop.f32.mrf.mxu0 }
 0x312   : > { %v662_v29 = vpop.f32.mrf.mxu3 }
 0x313   : > { %v663_v30 = vadd.f32 %v2452_v28, %v662_v29 }
 0x315   : > { %v674_v31 = vmax.f32 %v663_v30, 0.0 }
 0x317   : > { %2159 = vmatmul.msk.f32.vlgmr.msra.gmra.mxu0 %vm322_vm0, %v674_v31 }
 0x31a   : > { %v665_v32 = vpop.f32.mrf.mxu3 }
 0x31b   : > { %v666_v33 = vadd.f32 %v2452_v28, %v665_v32 }
 0x31d   : > { %v675_v34 = vmax.f32 %v666_v33, 0.0 }
 0x31f   : > { %2160 = vmatmul.msk.f32.gmra.mxu0 %vm322_vm0, %v675_v34 }
 0x322   : > { %v668_v35 = vpop.f32.mrf.mxu3 }
 0x323   : > { %v669_v36 = vadd.f32 %v2452_v28, %v668_v35 }
 0x325   : > { %v676_v37 = vmax.f32 %v669_v36, 0.0 }
 0x327   : > { %2161 = vmatmul.msk.f32.gmra.mxu0 %vm322_vm0, %v676_v37 }
 0x32a   : > { %v671_v38 = vpop.f32.mrf.mxu3 }
 0x32b   : > { %v672_v39 = vadd.f32 %v2452_v28, %v671_v38 }
 0x32d   : > { %v677_v40 = vmax.f32 %v672_v39, 0.0 }
 0x32f   : > { %2162 = vmatmul.msk.f32.gmra.mxu0 %vm322_vm0, %v677_v40 }
 0x394   : > { %v725_v42 = vpop.f32.mrf.mxu0 }
 0x395   : > { %v726_v47 = vadd.f32 %v2453_v43, %v725_v42 }
 0x397   : > { %v737_v51 = vsel %vm322_vm0, %v726_v47, 0.0 }
 0x39c   : > { %v728_v44 = vpop.f32.mrf.mxu0 }
 0x39d   : > { %v729_v45 = vadd.f32 %v2453_v43, %v728_v44 }
 0x39f   : > { %v740_v46 = vsel %vm322_vm0, %v729_v45, 0.0 }
 0x3a0   : > { %741 = vadd.xlane.f32.xlu2 %v740_v46 }
 0x3a4   : > { %v731_v48 = vpop.f32.mrf.mxu0 }
 0x3a5   : > { %v732_v49 = vadd.f32 %v2453_v43, %v731_v48 }
 0x3a7   : > { %v743_v50 = vsel %vm322_vm0, %v732_v49, 0.0 }
 0x3a8   : > { %744 = vadd.xlane.f32.xlu1 %v743_v50  ;;  %738 = vadd.xlane.f32.xlu2 %v737_v51 }
 0x3ac   : > { %v734_v52 = vpop.f32.mrf.mxu0 }
 0x3ad   : > { %v735_v53 = vadd.f32 %v2453_v43, %v734_v52 }
 0x3af   : > { %v746_v54 = vsel %vm322_vm0, %v735_v53, 0.0 }
 0x3b0   : > { %747 = vadd.xlane.f32.xlu0 %v746_v54 }
 0x413   : > { %v742_v62 = vpop.xlane.xlu2 %741 }
 0x414   : > { %v757_v63 = vmul.f32 %v2977_v61, %v742_v62 }
 0x416   : > { %v2980_v0 = vsub.f32 %v729_v45, %v757_v63 }
 0x418   : > { %v765_v2 = vmul.f32 %v2980_v0, %v2980_v0 }
 0x41a   : > { %v771_v3 = vsel %vm322_vm0, %v765_v2, 0.0 }
 0x41b   : > { %v745_v4 = vpop.xlane.xlu1 %744  ;;  %772 = vadd.xlane.f32.xlu2 %v771_v3  ;;  %v739_v16 = vpop.xlane.xlu2 %738 }
 0x41c   : > { %v758_v5 = vmul.f32 %v2977_v61, %v745_v4  ;;  %v756_v19 = vmul.f32 %v2977_v61, %v739_v16 }
 0x41e   : > { %v2986_v6 = vsub.f32 %v732_v49, %v758_v5  ;;  %v2997_v23 = vsub.f32 %v726_v47, %v756_v19 }
 0x420   : > { %v766_v11 = vmul.f32 %v2986_v6, %v2986_v6  ;;  %v764_v25 = vmul.f32 %v2997_v23, %v2997_v23 }
 0x422   : > { %v774_v15 = vsel %vm322_vm0, %v766_v11, 0.0  ;;  %v768_v26 = vsel %vm322_vm0, %v764_v25, 0.0  ;;  %v2454_v11 = vld [vmem:[#allocation8 + $0x16a] ss:$0 sm:$0xff] }
 0x423   : > { %v748_v17 = vpop.xlane.xlu0 %747  ;;  %775 = vadd.xlane.f32.xlu1 %v774_v15 }
 0x424   : > { %v759_v18 = vmul.f32 %v2977_v61, %v748_v17 }
 0x426   : > { %v2993_v20 = vsub.f32 %v735_v53, %v759_v18 }
 0x428   : > { %v767_v22 = vmul.f32 %v2993_v20, %v2993_v20 }
 0x42a   : > { %v777_v24 = vsel %vm322_vm0, %v767_v22, 0.0 }
 0x42b   : > { %778 = vadd.xlane.f32.xlu0 %v777_v24 }
 0x433   : > { %769 = vadd.xlane.f32.xlu0 %v768_v26  ;;  %2315 = vrot.lane.b32.xlu2 %v2922_v13, %s2701_s22  ;;  %v2455_v26 = vld [vmem:[#allocation8 + $0x16b] ss:$0 sm:$0xff] }
 0x43c   : > { %2310 = vrot.lane.b32.xlu1 %v2918_v12, %s2701_s22 }
 0x444   : > { %2325 = vrot.lane.b32.xlu1 %v2954_v14, %s2699_s3 }
 0x447   : > { %2320 = vrot.lane.b32.xlu0 %v2950_v1, %s2699_s3 }
 0x48e   : > { %v773_v27 = vpop.xlane.xlu2 %772 }
 0x48f   : > { %v781_v28 = vmul.f32 %v773_v27, %v2977_v61 }
 0x491   : > { %v785_v29 = vadd.f32 1e-05, %v781_v28 }
 0x493   : > { %2467 = vrsqrt.f32 %v785_v29  ;;  %vm804_vm6 = vweird.f32 %v785_v29 }
 0x496   : > { %v776_v30 = vpop.xlane.xlu1 %775  ;;  %v2316_v56 = vpop.permute.xlu2 %2315 }
 0x497   : > { %v782_v31 = vmul.f32 %v776_v30, %v2977_v61  ;;  %v2317_v2 = vunpack.i.l.bf16 %v2316_v56  ;;  %v2318_v15 = vunpack.i.h.bf16 %v2316_v56 }
 0x499   : > { %v2468_v32 = vpop.eup %2467  ;;  %v786_v33 = vadd.f32 1e-05, %v782_v31 }
 0x49a   : > { %v799_v13 = vmul.f32 %v2468_v32, %v785_v29  ;;  %vm805_vm3 = vweird.f32 %v2468_v32 }
 0x49b   : > { %2469 = vrsqrt.f32 %v786_v33  ;;  %vm814_vm4 = vweird.f32 %v786_v33  ;;  %vm3015_vm7 = vmor %vm804_vm6, %vm805_vm3 }
 0x49c   : > { %v800_v35 = vmul.f32 %v2468_v32, %v799_v13 }
 0x49e   : > { %v779_v34 = vpop.xlane.xlu0 %778  ;;  %v801_v39 = vmul.f32 0.5, %v800_v35 }
 0x49f   : > { %v783_v12 = vmul.f32 %v779_v34, %v2977_v61 }
 0x4a0   : > { %v802_v45 = vsub.f32 1.5, %v801_v39 }
 0x4a1   : > { %v2470_v36 = vpop.eup %2469  ;;  %v787_v37 = vadd.f32 1e-05, %v783_v12 }
 0x4a2   : > { %v809_v38 = vmul.f32 %v2470_v36, %v786_v33  ;;  %vm815_vm2 = vweird.f32 %v2470_v36  ;;  %v803_v51 = vmul.f32 %v2468_v32, %v802_v45 }
 0x4a3   : > { %2471 = vrsqrt.f32 %v787_v37  ;;  %vm816_vm5 = vmor %vm814_vm4, %vm815_vm2  ;;  %vm824_vm9 = vweird.f32 %v787_v37 }
 0x4a4   : > { %v810_v40 = vmul.f32 %v2470_v36, %v809_v38  ;;  %v807_v60 = vsel %vm3015_vm7, %v2468_v32, %v803_v51 }
 0x4a5   : > { %v829_v16 = vmul.f32 %v807_v60, %v2980_v0 }
 0x4a6   : > { %v811_v42 = vmul.f32 0.5, %v810_v40  ;;  %v770_v43 = vpop.xlane.xlu0 %769 }
 0x4a7   : > { %v780_v44 = vmul.f32 %v770_v43, %v2977_v61  ;;  %v994_v43 = vld [vmem:[#allocation8 + $0x40] sm:$0xff] }
 0x4a8   : > { %v812_v46 = vsub.f32 1.5, %v811_v42  ;;  %v996_v42 = vld [vmem:[#allocation8 + $0x50] sm:$0xff] }
 0x4a9   : > { %v2472_v47 = vpop.eup %2471  ;;  %v784_v48 = vadd.f32 1e-05, %v780_v44 }
 0x4aa   : > { %v813_v49 = vmul.f32 %v2470_v36, %v812_v46  ;;  %v819_v50 = vmul.f32 %v2472_v47, %v787_v37  ;;  %vm825_vm8 = vweird.f32 %v2472_v47 }
 0x4ab   : > { %2473 = vrsqrt.f32 %v784_v48  ;;  %vm826_vm10 = vmor %vm824_vm9, %vm825_vm8  ;;  %vm794_vm12 = vweird.f32 %v784_v48 }
 0x4ac   : > { %v820_v52 = vmul.f32 %v2472_v47, %v819_v50  ;;  %v817_v53 = vsel %vm816_vm5, %v2470_v36, %v813_v49  ;;  %v2457_v50 = vld [vmem:[#allocation8 + $0x168] ss:$0 sm:$0xff] }
 0x4ad   : > { %v830_v3 = vmul.f32 %v817_v53, %v2986_v6  ;;  %v835_v6 = vmul.f32 %v2454_v11, %v829_v16 }
 0x4ae   : > { %v821_v54 = vmul.f32 0.5, %v820_v52  ;;  %v2311_v55 = vpop.permute.xlu1 %2310 }
 0x4af   : > { %v2312_v58 = vunpack.i.l.bf16 %v2311_v55  ;;  %v2313_v59 = vunpack.i.h.bf16 %v2311_v55  ;;  %v836_v22 = vmul.f32 %v2454_v11, %v830_v3  ;;  %v841_v13 = vadd.f32 %v2455_v26, %v835_v6 }
 0x4b0   : > { %v822_v62 = vsub.f32 1.5, %v821_v54 }
 0x4b1   : > { %v2474_v63 = vpop.eup %2473  ;;  %589 = vmatpush.msrb.mxu1 %v2312_v58  ;;  %v842_v30 = vadd.f32 %v2455_v26, %v836_v22  ;;  %v845_v38 = vmax.f32 %v841_v13, 0.0 }
 0x4b2   : > { %v823_v4 = vmul.f32 %v2472_v47, %v822_v62  ;;  %v789_v5 = vmul.f32 %v2474_v63, %v784_v48  ;;  %vm795_vm11 = vweird.f32 %v2474_v63 }
 0x4b3   : > { %590 = vmatpush.msrb.mxu1 %v2313_v59  ;;  %vm796_vm13 = vmor %vm794_vm12, %vm795_vm11  ;;  %v846_v36 = vmax.f32 %v842_v30, 0.0  ;;  %v2459_v30 = vld [vmem:[#allocation8 + $0x16d] ss:$0 sm:$0xff]  ;;  %vm1421_vm11 = vcmask 785408   ;;  %vm1358_vm12 = vcmask 523264  }
 0x4b4   : > { %v827_v17 = vsel %vm826_vm10, %v2472_v47, %v823_v4  ;;  %v790_v18 = vmul.f32 %v2474_v63, %v789_v5 }
 0x4b5   : > { %v831_v19 = vmul.f32 %v827_v17, %v2993_v20  ;;  %591 = vmatpush.msrb.mxu1 %v2317_v2 }
 0x4b6   : > { %v791_v24 = vmul.f32 0.5, %v790_v18  ;;  %v2326_v0 = vpop.permute.xlu1 %2325 }
 0x4b7   : > { %592 = vmatpush.msrb.mxu1 %v2318_v15  ;;  %v837_v25 = vmul.f32 %v2454_v11, %v831_v19  ;;  %v2327_v12 = vunpack.i.l.bf16 %v2326_v0  ;;  %v2328_v37 = vunpack.i.h.bf16 %v2326_v0 }
 0x4b8   : > { %v792_v27 = vsub.f32 1.5, %v791_v24  ;;  %2150 = vmatmul.msk.f32.vlgmr.msrb.gmra.mxu1 %vm322_vm0, %v2971_v41 }
 0x4b9   : > { %v2321_v28 = vpop.permute.xlu0 %2320  ;;  %v843_v29 = vadd.f32 %v2455_v26, %v837_v25 }
 0x4ba   : > { %v793_v31 = vmul.f32 %v2474_v63, %v792_v27  ;;  %v2323_v32 = vunpack.i.h.bf16 %v2321_v28  ;;  %v2322_v20 = vunpack.i.l.bf16 %v2321_v28 }
 0x4bb   : > { %v847_v33 = vmax.f32 %v843_v29, 0.0 }
 0x4bc   : > { %v797_v34 = vsel %vm796_vm13, %v2474_v63, %v793_v31  ;;  %886 = vmatpush.msra.mxu1 %v2322_v20  ;;  %vm1689_vm13 = vcmask 253952  }
 0x4bd   : > { %v828_v35 = vmul.f32 %v797_v34, %v2997_v23  ;;  %977 = vmatpush.msrb.mxu0 %v847_v33  ;;  %v997_v23 = vld [vmem:[#allocation8 + $0x58] sm:$0xff] }
 0x4be   : > { %887 = vmatpush.msra.mxu1 %v2323_v32  ;;  %v3039_v44 = vpack.i.bf16 %v996_v42, %v997_v23 }
 0x4bf   : > { %v834_v41 = vmul.f32 %v2454_v11, %v828_v35  ;;  %978 = vmatpush.msrb.mxu0 %v846_v36  ;;  %v2458_v11 = vld [vmem:[#allocation8 + $0x16c] ss:$0 sm:$0xff] }
 0x4c0   : > { %888 = vmatpush.msra.mxu1 %v2327_v12  ;;  %2330 = vrot.lane.b32.xlu0 %v3039_v44, %s2698_s30 }
 0x4c1   : > { %979 = vmatpush.msrb.mxu0 %v845_v38  ;;  %v840_v39 = vadd.f32 %v2455_v26, %v834_v41 }
 0x4c2   : > { %889 = vmatpush.msra.mxu1 %v2328_v37 }
 0x4c3   : > { %v844_v40 = vmax.f32 %v840_v39, 0.0 }
 0x4c4   : > { %1024 = vmatpush.msrb.mxu1 %v997_v23 }
 0x4c5   : > { %2163 = vmatmul.msk.f32.vlgmr.msra.gmra.mxu1 %vm322_vm0, %v844_v40  ;;  %980 = vmatpush.msrb.mxu0 %v844_v40 }
 0x4c6   : > { %2169 = vmatmul.msk.f32.vlgmr.msrb.gmra.mxu0 %vm322_vm0, %v2902_v7  ;;  %1025 = vmatpush.msrb.mxu1 %v996_v42  ;;  %v995_v7 = vld [vmem:[#allocation8 + $0x48] sm:$0xff] }
 0x4c7   : > { %v3045_v45 = vpack.i.bf16 %v994_v43, %v995_v7 }
 0x4c8   : > { %1026 = vmatpush.msrb.mxu1 %v995_v7 }
 0x4c9   : > { %2335 = vrot.lane.b32.xlu2 %v3045_v45, %s2698_s30 }
 0x4ca   : > { %1027 = vmatpush.msrb.mxu1 %v994_v43 }
 0x4cd   : > { %2164 = vmatmul.msk.f32.gmra.mxu1 %vm322_vm0, %v845_v38 }
 0x4ce   : > { %2170 = vmatmul.msk.f32.gmra.mxu0 %vm322_vm0, %v2906_v8 }
 0x4d5   : > { %2165 = vmatmul.msk.f32.gmra.mxu1 %vm322_vm0, %v846_v36 }
 0x4d6   : > { %2171 = vmatmul.msk.f32.gmra.mxu0 %vm322_vm0, %v2910_v9 }
 0x4dd   : > { %2166 = vmatmul.msk.f32.gmra.mxu1 %vm322_vm0, %v847_v33 }
 0x4de   : > { %2172 = vmatmul.msk.f32.gmra.mxu0 %vm322_vm0, %v2914_v10 }
 0x523   : > { %v2336_v3 = vpop.permute.xlu2 %2335 }
 0x524   : > { %v2338_v4 = vunpack.i.h.bf16 %v2336_v3  ;;  %v2337_v5 = vunpack.i.l.bf16 %v2336_v3 }
 0x532   : > { %v2331_v62 = vpop.permute.xlu0 %2330 }
 0x533   : > { %v2333_v63 = vunpack.i.h.bf16 %v2331_v62  ;;  %v2332_v2 = vunpack.i.l.bf16 %v2331_v62 }
 0x535   : > { %v3043_v8 = vpop.f32.mrf.mxu1 }
 0x542   : > { %v891_v9 = vpop.f32.mrf.mxu1 }
 0x543   : > { %v982_v46 = vpop.f32.mrf.mxu0  ;;  %v892_v57 = vadd.f32 %v2457_v50, %v891_v9 }
 0x544   : > { %2173 = vmatmul.msk.f32.vlgmr.msrb.gmra.mxu1 %vm322_vm0, %v982_v46 }
 0x545   : > { %v903_v60 = vmax.f32 %v892_v57, 0.0 }
 0x54a   : > { %v894_v10 = vpop.f32.mrf.mxu1 }
 0x54b   : > { %v985_v47 = vpop.f32.mrf.mxu0  ;;  %v895_v55 = vadd.f32 %v2457_v50, %v894_v10 }
 0x54c   : > { %2174 = vmatmul.msk.f32.gmra.mxu1 %vm322_vm0, %v985_v47 }
 0x54d   : > { %v904_v59 = vmax.f32 %v895_v55, 0.0 }
 0x552   : > { %v897_v48 = vpop.f32.mrf.mxu1 }
 0x553   : > { %v988_v49 = vpop.f32.mrf.mxu0  ;;  %v898_v52 = vadd.f32 %v2457_v50, %v897_v48 }
 0x554   : > { %2175 = vmatmul.msk.f32.gmra.mxu1 %vm322_vm0, %v988_v49 }
 0x555   : > { %v905_v58 = vmax.f32 %v898_v52, 0.0 }
 0x55a   : > { %v900_v51 = vpop.f32.mrf.mxu1 }
 0x55b   : > { %v901_v53 = vadd.f32 %v2457_v50, %v900_v51  ;;  %v991_v54 = vpop.f32.mrf.mxu0 }
 0x55c   : > { %2176 = vmatmul.msk.f32.gmra.mxu1 %vm322_vm0, %v991_v54 }
 0x55d   : > { %v906_v56 = vmax.f32 %v901_v53, 0.0 }
 0x55f   : > { %919 = vmatpush.msra.mxu2 %v906_v56 }
 0x561   : > { %920 = vmatpush.msra.mxu2 %v905_v58 }
 0x563   : > { %921 = vmatpush.msra.mxu2 %v904_v59 }
 0x565   : > { %922 = vmatpush.msra.mxu2 %v903_v60 }
 0x566   : > { %2167 = vmatmul.msk.f32.vlgmr.msra.gmra.mxu2 %vm322_vm0, %v2963_v21 }
 0x567   : > { %1087 = vmatpush.msrb.mxu2 %v2332_v2 }
 0x569   : > { %1088 = vmatpush.msrb.mxu2 %v2333_v63 }
 0x56b   : > { %1089 = vmatpush.msrb.mxu2 %v2337_v5 }
 0x56d   : > { %1090 = vmatpush.msrb.mxu2 %v2338_v4 }
 0x5c1   : > { %v1029_v15 = vpop.f32.mrf.mxu1 }
 0x5c2   : > { %v1030_v16 = vadd.f32 %v2458_v11, %v1029_v15 }
 0x5c4   : > { %v1041_v17 = vmax.f32 %v1030_v16, 0.0 }
 0x5c6   : > { %2177 = vmatmul.msk.f32.vlgmr.msrb.gmra.mxu2 %vm322_vm0, %v1041_v17 }
 0x5c9   : > { %v1032_v18 = vpop.f32.mrf.mxu1 }
 0x5ca   : > { %v1033_v19 = vadd.f32 %v2458_v11, %v1032_v18 }
 0x5cc   : > { %v1042_v22 = vmax.f32 %v1033_v19, 0.0 }
 0x5ce   : > { %2178 = vmatmul.msk.f32.gmra.mxu2 %vm322_vm0, %v1042_v22 }
 0x5d1   : > { %v1035_v24 = vpop.f32.mrf.mxu1 }
 0x5d2   : > { %v1036_v25 = vadd.f32 %v2458_v11, %v1035_v24 }
 0x5d4   : > { %v1043_v26 = vmax.f32 %v1036_v25, 0.0 }
 0x5d6   : > { %2179 = vmatmul.msk.f32.gmra.mxu2 %vm322_vm0, %v1043_v26 }
 0x5d9   : > { %v1038_v6 = vpop.f32.mrf.mxu1 }
 0x5da   : > { %v1039_v27 = vadd.f32 %v2458_v11, %v1038_v6 }
 0x5dc   : > { %v1044_v28 = vmax.f32 %v1039_v27, 0.0 }
 0x5de   : > { %2180 = vmatmul.msk.f32.gmra.mxu2 %vm322_vm0, %v1044_v28 }
 0x5e9   : > { %v3059_v29 = vpop.f32.mrf.mxu2 }
 0x649   : > { %v1092_v0 = vpop.f32.mrf.mxu2 }
 0x64a   : > { %v1093_v31 = vadd.f32 %v2459_v30, %v1092_v0 }
 0x64c   : > { %v1104_v32 = vsel %vm322_vm0, %v1093_v31, 0.0 }
 0x64d   : > { %1105 = vadd.xlane.f32.xlu1 %v1104_v32 }
 0x651   : > { %v1095_v20 = vpop.f32.mrf.mxu2 }
 0x652   : > { %v1096_v33 = vadd.f32 %v2459_v30, %v1095_v20 }
 0x654   : > { %v1107_v13 = vsel %vm322_vm0, %v1096_v33, 0.0 }
 0x655   : > { %1108 = vadd.xlane.f32.xlu0 %v1107_v13 }
 0x659   : > { %v1098_v34 = vpop.f32.mrf.mxu2 }
 0x65a   : > { %v1099_v12 = vadd.f32 %v2459_v30, %v1098_v34 }
 0x65c   : > { %v1110_v35 = vsel %vm322_vm0, %v1099_v12, 0.0 }
 0x65d   : > { %1111 = vadd.xlane.f32.xlu2 %v1110_v35 }
 0x661   : > { %v1101_v36 = vpop.f32.mrf.mxu2 }
 0x662   : > { %v1102_v37 = vadd.f32 %v2459_v30, %v1101_v36 }
 0x664   : > { %v1113_v41 = vsel %vm322_vm0, %v1102_v37, 0.0 }
 0x665   : > { %1114 = vadd.xlane.f32.xlu1 %v1113_v41 }
 0x67e   : > { %2340 = vrot.lane.b32.xlu1 %v2950_v1, %s2701_s22 }
 0x686   : > { %2355 = vrot.lane.b32.xlu1 %v3045_v45, %s2699_s3 }
 0x68e   : > { %2365 = vrot.lane.b32.xlu1 %v3045_v45, %s2701_s22 }
 0x6c0   : > { %v1106_v38 = vpop.xlane.xlu1 %1105 }
 0x6c1   : > { %v1116_v39 = vmul.f32 %v1106_v38, %v2977_v61 }
 0x6c3   : > { %v3068_v40 = vsub.f32 %v1093_v31, %v1116_v39 }
 0x6c5   : > { %v1124_v23 = vmul.f32 %v3068_v40, %v3068_v40 }
 0x6c7   : > { %v1128_v42 = vsel %vm322_vm0, %v1124_v23, 0.0  ;;  %v2461_v23 = vld [vmem:[#allocation8 + $0x171] ss:$0 sm:$0xff] }
 0x6c8   : > { %v1109_v7 = vpop.xlane.xlu0 %1108  ;;  %1129 = vadd.xlane.f32.xlu0 %v1128_v42 }
 0x6c9   : > { %v1117_v43 = vmul.f32 %v1109_v7, %v2977_v61 }
 0x6cb   : > { %v3074_v9 = vsub.f32 %v1096_v33, %v1117_v43 }
 0x6cd   : > { %v1125_v46 = vmul.f32 %v3074_v9, %v3074_v9 }
 0x6cf   : > { %v1131_v1 = vsel %vm322_vm0, %v1125_v46, 0.0 }
 0x6d0   : > { %v1112_v10 = vpop.xlane.xlu2 %1111  ;;  %1132 = vadd.xlane.f32.xlu2 %v1131_v1 }
 0x6d1   : > { %v1118_v47 = vmul.f32 %v1112_v10, %v2977_v61 }
 0x6d3   : > { %v3080_v48 = vsub.f32 %v1099_v12, %v1118_v47  ;;  %v2460_v12 = vld [vmem:[#allocation8 + $0x170] ss:$0 sm:$0xff] }
 0x6d5   : > { %v1126_v49 = vmul.f32 %v3080_v48, %v3080_v48 }
 0x6d7   : > { %v1134_v50 = vsel %vm322_vm0, %v1126_v49, 0.0 }
 0x6d8   : > { %1135 = vadd.xlane.f32.xlu0 %v1134_v50  ;;  %v1115_v51 = vpop.xlane.xlu1 %1114 }
 0x6d9   : > { %v1119_v52 = vmul.f32 %v1115_v51, %v2977_v61 }
 0x6db   : > { %v3088_v53 = vsub.f32 %v1102_v37, %v1119_v52 }
 0x6dd   : > { %v1127_v54 = vmul.f32 %v3088_v53, %v3088_v53 }
 0x6df   : > { %v1137_v55 = vsel %vm322_vm0, %v1127_v54, 0.0 }
 0x6e0   : > { %1138 = vadd.xlane.f32.xlu0 %v1137_v55 }
 0x6e8   : > { %2345 = vrot.lane.b32.xlu2 %v2954_v14, %s2701_s22 }
 0x6f0   : > { %v2341_v56 = vpop.permute.xlu1 %2340  ;;  %2360 = vrot.lane.b32.xlu2 %v3039_v44, %s2701_s22 }
 0x6f1   : > { %v2342_v57 = vunpack.i.l.bf16 %v2341_v56  ;;  %v2343_v58 = vunpack.i.h.bf16 %v2341_v56 }
 0x6f3   : > { %956 = vmatpush.msra.mxu3 %v2342_v57 }
 0x6f4   : > { %2350 = vrot.lane.b32.xlu0 %v3039_v44, %s2699_s3 }
 0x6f5   : > { %957 = vmatpush.msra.mxu3 %v2343_v58 }
 0x6f8   : > { %v2356_v39 = vpop.permute.xlu1 %2355 }
 0x6f9   : > { %v2357_v10 = vunpack.i.l.bf16 %v2356_v39  ;;  %v2358_v51 = vunpack.i.h.bf16 %v2356_v39 }
 0x73b   : > { %v1130_v59 = vpop.xlane.xlu0 %1129 }
 0x73c   : > { %v1140_v60 = vmul.f32 %v1130_v59, %v2977_v61 }
 0x73e   : > { %v1144_v62 = vadd.f32 1e-05, %v1140_v60 }
 0x740   : > { %2475 = vrsqrt.f32 %v1144_v62  ;;  %vm1154_vm15 = vweird.f32 %v1144_v62 }
 0x743   : > { %v1133_v63 = vpop.xlane.xlu2 %1132 }
 0x744   : > { %v1141_v2 = vmul.f32 %v1133_v63, %v2977_v61 }
 0x746   : > { %v1145_v3 = vadd.f32 1e-05, %v1141_v2  ;;  %v2476_v4 = vpop.eup %2475 }
 0x747   : > { %v1149_v14 = vmul.f32 %v2476_v4, %v1144_v62  ;;  %vm1155_vm14 = vweird.f32 %v2476_v4 }
 0x748   : > { %2477 = vrsqrt.f32 %v1145_v3  ;;  %vm1156_vm1 = vmor %vm1154_vm15, %vm1155_vm14  ;;  %vm1164_vm3 = vweird.f32 %v1145_v3  ;;  %vm1778_vm14 = vcmask 7168   ;;  %vm1780_vm15 = vcmask 15360  }
 0x749   : > { %v1150_v19 = vmul.f32 %v2476_v4, %v1149_v14 }
 0x74b   : > { %v2346_v5 = vpop.permute.xlu2 %2345  ;;  %v1136_v11 = vpop.xlane.xlu0 %1135  ;;  %v1151_v24 = vmul.f32 0.5, %v1150_v19 }
 0x74c   : > { %v2348_v15 = vunpack.i.h.bf16 %v2346_v5  ;;  %v2347_v16 = vunpack.i.l.bf16 %v2346_v5  ;;  %v1142_v17 = vmul.f32 %v1136_v11, %v2977_v61  ;;  %v1371_v5 = vld [vmem:[#allocation8 + $0xd8] sm:$0xff] }
 0x74d   : > { %v1152_v28 = vsub.f32 1.5, %v1151_v24 }
 0x74e   : > { %v1146_v18 = vadd.f32 1e-05, %v1142_v17  ;;  %958 = vmatpush.msra.mxu3 %v2347_v16  ;;  %v2478_v22 = vpop.eup %2477  ;;  %v1365_v16 = vld [vmem:[#allocation8 + $0xa8] sm:$0xff] }
 0x74f   : > { %v1159_v25 = vmul.f32 %v2478_v22, %v1145_v3  ;;  %v1153_v31 = vmul.f32 %v2476_v4, %v1152_v28  ;;  %vm1165_vm2 = vweird.f32 %v2478_v22 }
 0x750   : > { %959 = vmatpush.msra.mxu3 %v2348_v15  ;;  %2479 = vrsqrt.f32 %v1146_v18  ;;  %vm1166_vm4 = vmor %vm1164_vm3, %vm1165_vm2  ;;  %vm1174_vm6 = vweird.f32 %v1146_v18  ;;  %v1364_v15 = vld [vmem:[#allocation8 + $0xa0] sm:$0xff]  ;;  %vm1784_vm2 = vcmask 31744   ;;  %vm1786_vm3 = vcmask 39936  }
 0x751   : > { %2168 = vmatmul.msk.f32.vlgmr.msra.gmra.mxu3 %vm322_vm0, %v3059_v29  ;;  %v1160_v30 = vmul.f32 %v2478_v22, %v1159_v25  ;;  %v1157_v33 = vsel %vm1156_vm1, %v2476_v4, %v1153_v31  ;;  %v3114_v17 = vpack.i.bf16 %v1364_v15, %v1365_v16  ;;  %vm1782_vm1 = vcmask 23552  }
 0x752   : > { %v1188_v35 = vmul.f32 %v1157_v33, %v3068_v40 }
 0x753   : > { %v1139_v26 = vpop.xlane.xlu0 %1138  ;;  %v1161_v32 = vmul.f32 0.5, %v1160_v30 }
 0x754   : > { %v1143_v6 = vmul.f32 %v1139_v26, %v2977_v61  ;;  %v1194_v41 = vmul.f32 %v2460_v12, %v1188_v35 }
 0x755   : > { %v1162_v13 = vsub.f32 1.5, %v1161_v32 }
 0x756   : > { %v1147_v27 = vadd.f32 1e-05, %v1143_v6  ;;  %v2480_v0 = vpop.eup %2479  ;;  %v1200_v47 = vadd.f32 %v2461_v23, %v1194_v41 }
 0x757   : > { %v1169_v20 = vmul.f32 %v2480_v0, %v1146_v18  ;;  %v1163_v36 = vmul.f32 %v2478_v22, %v1162_v13  ;;  %vm1175_vm5 = vweird.f32 %v2480_v0  ;;  %v2463_v13 = vld [vmem:[#allocation8 + $0x16e] ss:$0 sm:$0xff] }
 0x758   : > { %2481 = vrsqrt.f32 %v1147_v27  ;;  %vm1176_vm7 = vmor %vm1174_vm6, %vm1175_vm5  ;;  %v1204_v52 = vmax.f32 %v1200_v47, 0.0  ;;  %vm1184_vm9 = vweird.f32 %v1147_v27  ;;  %v1449_v47 = vld [vmem:[#allocation8 + $0x78] sm:$0xff]  ;;  %vm1790_vm5 = vcmask 56320  }
 0x759   : > { %v1170_v29 = vmul.f32 %v2480_v0, %v1169_v20  ;;  %v1167_v42 = vsel %vm1166_vm4, %v2478_v22, %v1163_v36  ;;  %vm1788_vm4 = vcmask 48128   ;;  %vm1792_vm6 = vcmask 64512  }
 0x75a   : > { %v1189_v40 = vmul.f32 %v1167_v42, %v3074_v9  ;;  %v2366_v42 = vpop.permute.xlu1 %2365 }
 0x75b   : > { %v1171_v61 = vmul.f32 0.5, %v1170_v29 }
 0x75c   : > { %v1195_v54 = vmul.f32 %v2460_v12, %v1189_v40  ;;  %v1448_v40 = vld [vmem:[#allocation8 + $0x70] sm:$0xff] }
 0x75d   : > { %v1172_v7 = vsub.f32 1.5, %v1171_v61 }
 0x75e   : > { %v2482_v34 = vpop.eup %2481  ;;  %v1201_v57 = vadd.f32 %v2461_v23, %v1195_v54  ;;  %v3131_v54 = vpack.i.bf16 %v1448_v40, %v1449_v47 }
 0x75f   : > { %v1179_v37 = vmul.f32 %v2482_v34, %v1147_v27  ;;  %v1173_v49 = vmul.f32 %v2480_v0, %v1172_v7  ;;  %vm1185_vm8 = vweird.f32 %v2482_v34  ;;  %v2368_v7 = vunpack.i.h.bf16 %v2366_v42 }
 0x760   : > { %vm1186_vm10 = vmor %vm1184_vm9, %vm1185_vm8  ;;  %v1205_v44 = vmax.f32 %v1201_v57, 0.0  ;;  %v3141_v57 = vld [vmem:[#allocation8 + $0x98] sm:$0xff]  ;;  %vm1796_vm8 = vcmask 80896   ;;  %vm1798_vm9 = vcmask 89088  }
 0x761   : > { %v1180_v43 = vmul.f32 %v2482_v34, %v1179_v37  ;;  %v1177_v55 = vsel %vm1176_vm7, %v2480_v0, %v1173_v49  ;;  %v2361_v0 = vpop.permute.xlu2 %2360  ;;  %v3124_v49 = vld [vmem:[#allocation8 + $0x80] sm:$0xff]  ;;  %vm1794_vm7 = vcmask 72704  }
 0x762   : > { %v1190_v9 = vmul.f32 %v1177_v55, %v3080_v48  ;;  %v1370_v48 = vld [vmem:[#allocation8 + $0xd0] sm:$0xff]  ;;  %v2363_v31 = vunpack.i.h.bf16 %v2361_v0  ;;  %v2362_v32 = vunpack.i.l.bf16 %v2361_v0 }
 0x763   : > { %v1181_v50 = vmul.f32 0.5, %v1180_v43  ;;  %v2369_v11 = vpack.i.bf16 %v1370_v48, %v1371_v5  ;;  %v2367_v43 = vunpack.i.l.bf16 %v2366_v42 }
 0x764   : > { %v1196_v59 = vmul.f32 %v2460_v12, %v1190_v9  ;;  %1316 = vmatpush.msra.mxu1 %v2362_v32 }
 0x765   : > { %v1182_v56 = vsub.f32 1.5, %v1181_v50  ;;  %2370 = vrot.lane.b32.xlu2 %v2369_v11, %s2698_s30  ;;  %v3126_v50 = vld [vmem:[#allocation8 + $0x88] sm:$0xff] }
 0x766   : > { %v2351_v38 = vpop.permute.xlu0 %2350  ;;  %v1202_v62 = vadd.f32 %v2461_v23, %v1196_v59  ;;  %1317 = vmatpush.msra.mxu1 %v2363_v31  ;;  %v1369_v59 = vld [vmem:[#allocation8 + $0xc8] sm:$0xff] }
 0x767   : > { %v2352_v46 = vunpack.i.l.bf16 %v2351_v38  ;;  %v2353_v1 = vunpack.i.h.bf16 %v2351_v38  ;;  %v1183_v58 = vmul.f32 %v2482_v34, %v1182_v56  ;;  %v3139_v56 = vld [vmem:[#allocation8 + $0x90] sm:$0xff] }
 0x768   : > { %v1206_v2 = vmax.f32 %v1202_v62, 0.0  ;;  %1318 = vmatpush.msra.mxu1 %v2367_v43  ;;  %v2464_v62 = vld [vmem:[#allocation8 + $0x16f] ss:$0 sm:$0xff] }
 0x769   : > { %1246 = vmatpush.msrb.mxu3 %v2352_v46  ;;  %v1187_v60 = vsel %vm1186_vm10, %v2482_v34, %v1183_v58  ;;  %v1366_v46 = vld [vmem:[#allocation8 + $0xb0] sm:$0xff]  ;;  %v2429_v58 = vpack.i.bf16 %v3139_v56, %v3141_v57  ;;  %vm1800_vm10 = vcmask 97280  }
 0x76a   : > { %v1191_v63 = vmul.f32 %v1187_v60, %v3088_v53  ;;  %v2462_v53 = vld [vmem:[#allocation8 + $0x169] ss:$0 sm:$0xff]  ;;  %1319 = vmatpush.msra.mxu1 %v2368_v7 }
 0x76b   : > { %1247 = vmatpush.msrb.mxu3 %v2353_v1  ;;  %v1367_v1 = vld [vmem:[#allocation8 + $0xb8] sm:$0xff] }
 0x76c   : > { %v1197_v3 = vmul.f32 %v2460_v12, %v1191_v63 }
 0x76d   : > { %1248 = vmatpush.msrb.mxu3 %v2357_v10  ;;  %2385 = vrot.lane.b32.xlu2 %v3114_v17, %s2698_s30  ;;  %v2379_v10 = vpack.i.bf16 %v1366_v46, %v1367_v1 }
 0x76e   : > { %v1203_v4 = vadd.f32 %v2461_v23, %v1197_v3 }
 0x76f   : > { %1249 = vmatpush.msrb.mxu3 %v2358_v51  ;;  %2380 = vrot.lane.b32.xlu1 %v2379_v10, %s2698_s30  ;;  %v2394_v51 = vpack.i.bf16 %v3124_v49, %v3126_v50 }
 0x770   : > { %2181 = vmatmul.msk.f32.vlgmr.msrb.gmra.mxu3 %vm322_vm0, %v1204_v52  ;;  %v1207_v14 = vmax.f32 %v1203_v4, 0.0  ;;  %v1446_v52 = vld [vmem:[#allocation8 + $0x60] sm:$0xff] }
 0x771   : > { %1466 = vmatpush.msra.mxu3 %v1449_v47 }
 0x773   : > { %1467 = vmatpush.msra.mxu3 %v1448_v40 }
 0x777   : > { %2395 = vrot.lane.b32.xlu1 %v2394_v51, %s2698_s30 }
 0x778   : > { %2182 = vmatmul.msk.f32.gmra.mxu3 %vm322_vm0, %v1205_v44  ;;  %v1368_v44 = vld [vmem:[#allocation8 + $0xc0] sm:$0xff] }
 0x779   : > { %v2374_v60 = vpack.i.bf16 %v1368_v44, %v1369_v59 }
 0x77b   : > { %2375 = vrot.lane.b32.xlu0 %v2374_v60, %s2698_s30 }
 0x77f   : > { %2400 = vrot.lane.b32.xlu1 %v3131_v54, %s2698_s30 }
 0x780   : > { %2183 = vmatmul.msk.f32.gmra.mxu3 %vm322_vm0, %v1206_v2 }
 0x783   : > { %2390 = vrot.lane.b32.xlu0 %v2429_v58, %s2698_s30 }
 0x788   : > { %2184 = vmatmul.msk.f32.gmra.mxu3 %vm322_vm0, %v1207_v14 }
 0x7bf   : > { %v2371_v39 = vpop.permute.xlu2 %2370 }
 0x7c0   : > { %v2373_v23 = vunpack.i.h.bf16 %v2371_v39  ;;  %v2372_v45 = vunpack.i.l.bf16 %v2371_v39 }
 0x7c2   : > { %1429 = vmatpush.msra.mxu2 %v2372_v45 }
 0x7c4   : > { %1430 = vmatpush.msra.mxu2 %v2373_v23  ;;  %v1572_v23 = vld [vmem:[#allocation8 + $0xe0] sm:$0xff] }
 0x7c7   : > { %v2386_v16 = vpop.permute.xlu2 %2385 }
 0x7c8   : > { %v2387_v32 = vunpack.i.l.bf16 %v2386_v16 }
 0x7d4   : > { %v961_v18 = vpop.f32.mrf.mxu3 }
 0x7d5   : > { %v962_v19 = vadd.f32 %v2462_v53, %v961_v18 }
 0x7d7   : > { %v964_v22 = vmax.f32 %v962_v19, 0.0 }
 0x7d9   : > { %v1334_v24 = vrot.slane %v964_v22, 1 }
 0x7db   : > { %v1336_v25 = vsub.f32 %v964_v22, %v1334_v24 }
 0x7dd   : > { %v1337_v26 = vmul.f32 %v1336_v25, %v1336_v25 }
 0x7df   : > { %v1338_v6 = vsub.f32 0.0, %v1337_v26 }
 0x7e1   : > { %v1339_v27 = vmul.f32 1.442695, %v1338_v6  ;;  %v2381_v53 = vpop.permute.xlu1 %2380 }
 0x7e2   : > { %v2382_v31 = vunpack.i.l.bf16 %v2381_v53 }
 0x7e3   : > { %2483 = vpow2.f32 %v1339_v27 }
 0x7e9   : > { %v2484_v28 = vpop.eup %2483  ;;  %v2396_v18 = vpop.permute.xlu1 %2395 }
 0x7ea   : > { %1350 = vrot.lane.b32.xlu2 %v2484_v28, %s2701_s22 }
 0x7ed   : > { %v2376_v28 = vpop.permute.xlu0 %2375 }
 0x7ee   : > { %v2377_v0 = vunpack.i.l.bf16 %v2376_v28 }
 0x7f0   : > { %1431 = vmatpush.msra.mxu2 %v2377_v0 }
 0x7f1   : > { %v2401_v22 = vpop.permute.xlu1 %2400 }
 0x7f2   : > { %v2403_v24 = vunpack.i.h.bf16 %v2401_v22  ;;  %v2402_v25 = vunpack.i.l.bf16 %v2401_v22 }
 0x7f3   : > { %v1251_v30 = vpop.f32.mrf.mxu3 }
 0x7f4   : > { %v1252_v61 = vadd.f32 %v2463_v13, %v1251_v30  ;;  %v2378_v30 = vunpack.i.h.bf16 %v2376_v28  ;;  %v1598_v28 = vld [vmem:[#allocation8 + $0x100] sm:$0xff] }
 0x7f6   : > { %v1263_v38 = vmax.f32 %v1252_v61, 0.0  ;;  %1432 = vmatpush.msra.mxu2 %v2378_v30  ;;  %v1372_v30 = vld [vmem:[#allocation8 + $0x172] sm:$0x1] }
 0x7f8   : > { %1433 = vmatpush.msra.mxu2 %v2382_v31 }
 0x7fb   : > { %v1254_v20 = vpop.f32.mrf.mxu3 }
 0x7fc   : > { %v1255_v35 = vadd.f32 %v2463_v13, %v1254_v20  ;;  %v2391_v20 = vpop.permute.xlu0 %2390 }
 0x7fe   : > { %v1264_v41 = vmax.f32 %v1255_v35, 0.0  ;;  %v2398_v35 = vunpack.i.h.bf16 %v2396_v18 }
 0x803   : > { %v1257_v33 = vpop.f32.mrf.mxu3 }
 0x804   : > { %v1258_v34 = vadd.f32 %v2463_v13, %v1257_v33  ;;  %v2388_v33 = vunpack.i.h.bf16 %v2386_v16 }
 0x806   : > { %v1265_v37 = vmax.f32 %v1258_v34, 0.0  ;;  %v2456_v34 = vld [vmem:[#allocation8 + $0x163] ss:$0 sm:$0xff] }
 0x80b   : > { %v1260_v29 = vpop.f32.mrf.mxu3 }
 0x80c   : > { %v1261_v12 = vadd.f32 %v2463_v13, %v1260_v29  ;;  %v2392_v13 = vunpack.i.l.bf16 %v2391_v20  ;;  %v2393_v29 = vunpack.i.h.bf16 %v2391_v20 }
 0x80e   : > { %v1266_v36 = vmax.f32 %v1261_v12, 0.0  ;;  %v2397_v12 = vunpack.i.l.bf16 %v2396_v18 }
 0x810   : > { %1279 = vmatpush.msra.mxu0 %v1266_v36  ;;  %v595_v36 = vadd.f32 %v2456_v34, %v3043_v8 }
 0x812   : > { %1280 = vmatpush.msra.mxu0 %v1265_v37  ;;  %v597_v61 = vmax.f32 %v595_v36, 0.0  ;;  %v1575_v37 = vld [vmem:[#allocation8 + $0xf8] sm:$0xff]  ;;  %v1623_v36 = vld [vmem:[#allocation8 + $0x128] sm:$0xff] }
 0x814   : > { %1281 = vmatpush.msra.mxu0 %v1264_v41  ;;  %v1574_v41 = vld [vmem:[#allocation8 + $0xf0] sm:$0xff]  ;;  %v1326_v39 = vrot.slane %v597_v61, 1 }
 0x816   : > { %1282 = vmatpush.msra.mxu0 %v1263_v38  ;;  %v1573_v38 = vld [vmem:[#allocation8 + $0xe8] sm:$0xff]  ;;  %v1328_v45 = vsub.f32 %v597_v61, %v1326_v39  ;;  %v1622_v61 = vld [vmem:[#allocation8 + $0x120] sm:$0xff] }
 0x817   : > { %2185 = vmatmul.msk.f32.vlgmr.msra.gmra.mxu0 %vm322_vm0, %v2963_v21  ;;  %v1447_v21 = vld [vmem:[#allocation8 + $0x68] sm:$0xff] }
 0x818   : > { %1468 = vmatpush.msra.mxu3 %v1447_v21  ;;  %v3135_v55 = vpack.i.bf16 %v1446_v52, %v1447_v21  ;;  %1507 = vmatpush.msrb.mxu0 %v2402_v25  ;;  %v1329_v42 = vmul.f32 %v1328_v45, %v1328_v45 }
 0x81a   : > { %1469 = vmatpush.msra.mxu3 %v1446_v52  ;;  %2415 = vrot.lane.b32.xlu1 %v3135_v55, %s2699_s3  ;;  %v1330_v7 = vsub.f32 0.0, %v1329_v42 }
 0x81b   : > { %2405 = vrot.lane.b32.xlu2 %v3135_v55, %s2698_s30  ;;  %1508 = vmatpush.msrb.mxu0 %v2403_v24 }
 0x81c   : > { %v1331_v43 = vmul.f32 1.442695, %v1330_v7 }
 0x822   : > { %2430 = vrot.lane.b32.xlu1 %v2429_v58, %s2699_s3 }
 0x823   : > { %2420 = vrot.lane.b32.xlu2 %v2379_v10, %s2699_s3 }
 0x82b   : > { %2435 = vrot.lane.b32.xlu2 %v2394_v51, %s2699_s3 }
 0x844   : > { %v1351_v19 = vpop.permute.xlu2 %1350 }
 0x875   : > { %v2406_v26 = vpop.permute.xlu2 %2405 }
 0x876   : > { %v2407_v6 = vunpack.i.l.bf16 %v2406_v26  ;;  %v2408_v27 = vunpack.i.h.bf16 %v2406_v26  ;;  %v1601_v26 = vld [vmem:[#allocation8 + $0x118] sm:$0xff] }
 0x877   : > { %1614 = vmatpush.msrb.mxu3 %v1601_v26 }
 0x878   : > { %1509 = vmatpush.msrb.mxu0 %v2407_v6  ;;  %v1600_v6 = vld [vmem:[#allocation8 + $0x110] sm:$0xff] }
 0x879   : > { %1615 = vmatpush.msrb.mxu3 %v1600_v6 }
 0x87a   : > { %1510 = vmatpush.msrb.mxu0 %v2408_v27  ;;  %v1599_v27 = vld [vmem:[#allocation8 + $0x108] sm:$0xff] }
 0x87b   : > { %1616 = vmatpush.msrb.mxu3 %v1599_v27 }
 0x87d   : > { %v2421_v46 = vpop.permute.xlu2 %2420  ;;  %1617 = vmatpush.msrb.mxu3 %v1598_v28 }
 0x87e   : > { %v2422_v8 = vunpack.i.l.bf16 %v2421_v46  ;;  %v2423_v40 = vunpack.i.h.bf16 %v2421_v46 }
 0x88c   : > { %v2416_v51 = vpop.permute.xlu1 %2415 }
 0x88d   : > { %v2417_v44 = vunpack.i.l.bf16 %v2416_v51  ;;  %v2418_v59 = vunpack.i.h.bf16 %v2416_v51  ;;  %v1647_v51 = vld [vmem:[#allocation8 + $0x148] sm:$0xff] }
 0x894   : > { %v1284_v9 = vpop.f32.mrf.mxu0  ;;  %v2431_v60 = vpop.permute.xlu1 %2430 }
 0x895   : > { %2186 = vmatmul.msk.f32.vlgmr.msra.gmra.mxu1 %vm322_vm0, %v1284_v9 }
 0x912   : > { %v1321_v63 = vpop.f32.mrf.mxu1 }
 0x913   : > { %v1322_v2 = vadd.f32 %v2464_v62, %v1321_v63 }
 0x915   : > { %v3153_v3 = vmax.f32 %v1322_v2, 0.0 }
 0x917   : > { %1670 = vrot.lane.b32.xlu1 %v3153_v3, %s2701_s22  ;;  %v1342_v4 = vrot.slane %v3153_v3, 1  ;;  %1673 = vrot.lane.b32.xlu2 %v3153_v3, %s2699_s3 }
 0x919   : > { %v1344_v14 = vsub.f32 %v3153_v3, %v1342_v4 }
 0x91b   : > { %v1345_v48 = vmul.f32 %v1344_v14, %v1344_v14  ;;  %v2433_v14 = vunpack.i.h.bf16 %v2431_v60 }
 0x91d   : > { %v1346_v5 = vsub.f32 0.0, %v1345_v48  ;;  %v2436_v48 = vpop.permute.xlu2 %2435 }
 0x91f   : > { %v1347_v11 = vmul.f32 1.442695, %v1346_v5  ;;  %v2437_v5 = vunpack.i.l.bf16 %v2436_v48 }
 0x921   : > { %2485 = vpow2.f32 %v1347_v11 }
 0x922   : > { %2487 = vpow2.f32 %v1331_v43 }
 0x927   : > { %v2486_v15 = vpop.eup %2485 }
 0x928   : > { %1354 = vrot.lane.b32.xlu0 %v2486_v15, %s2699_s3  ;;  %v2488_v1 = vpop.eup %2487  ;;  %v2438_v15 = vunpack.i.h.bf16 %v2436_v48 }
 0x929   : > { %v1357_v10 = vsel %vm322_vm0, %v2488_v1, %v1351_v19 }
 0x930   : > { %2410 = vrot.lane.b32.xlu0 %v3131_v54, %s2699_s3 }
 0x938   : > { %2425 = vrot.lane.b32.xlu0 %v3114_v17, %s2699_s3  ;;  %v2383_v17 = vunpack.i.h.bf16 %v2381_v53 }
 0x93a   : > { %1434 = vmatpush.msra.mxu2 %v2383_v17 }
 0x93c   : > { %1435 = vmatpush.msra.mxu2 %v2387_v32 }
 0x93e   : > { %1436 = vmatpush.msra.mxu2 %v2388_v33 }
 0x940   : > { %1810 = vrot.lane.b32.xlu0 %v1342_v4, %s2701_s22  ;;  %1437 = vmatpush.msra.mxu2 %v2392_v13  ;;  %v2432_v4 = vunpack.i.l.bf16 %v2431_v60 }
 0x942   : > { %1438 = vmatpush.msra.mxu2 %v2393_v29 }
 0x944   : > { %1439 = vmatpush.msra.mxu2 %v2397_v12  ;;  %v1625_v12 = vld [vmem:[#allocation8 + $0x138] sm:$0xff] }
 0x945   : > { %1638 = vmatpush.msra.mxu0 %v1625_v12 }
 0x946   : > { %1440 = vmatpush.msra.mxu2 %v2398_v35  ;;  %v1624_v35 = vld [vmem:[#allocation8 + $0x130] sm:$0xff] }
 0x947   : > { %1639 = vmatpush.msra.mxu0 %v1624_v35 }
 0x948   : > { %1676 = vrot.lane.b32.xlu0 %v3153_v3, %s2698_s30  ;;  %1590 = vmatpush.msrb.mxu2 %v1575_v37 }
 0x949   : > { %1640 = vmatpush.msra.mxu0 %v1623_v36 }
 0x94a   : > { %1591 = vmatpush.msrb.mxu2 %v1574_v41 }
 0x94b   : > { %1641 = vmatpush.msra.mxu0 %v1622_v61 }
 0x94c   : > { %1592 = vmatpush.msrb.mxu2 %v1573_v38 }
 0x94e   : > { %1593 = vmatpush.msrb.mxu2 %v1572_v23  ;;  %v1450_v23 = vld [vmem:[#allocation8 + $0x173] sm:$0x1] }
 0x971   : > { %v1674_v19 = vpop.permute.xlu2 %1673 }
 0x989   : > { %v1671_v16 = vpop.permute.xlu1 %1670 }
 0x98a   : > { %v1679_v53 = vsel %vm322_vm0, %v3153_v3, %v1671_v16 }
 0x98b   : > { %v1680_v22 = vsel %vm1358_vm12, %v1679_v53, %v1674_v19 }
 0x99a   : > { %v1355_v47 = vpop.permute.xlu0 %1354 }
 0x99b   : > { %v1359_v21 = vsel %vm1358_vm12, %v1357_v10, %v1355_v47  ;;  %v1649_v10 = vld [vmem:[#allocation8 + $0x158] sm:$0xff] }
 0x99c   : > { %2187 = vmatmul.msk.f32.vlgmr.msra.gmra.mxu2 %vm1421_vm11, %v1359_v21  ;;  %v1648_v21 = vld [vmem:[#allocation8 + $0x150] sm:$0xff] }
 0x99d   : > { %1865 = vmatpush.msra.mxu2 %v2422_v8 }
 0x99f   : > { %1866 = vmatpush.msra.mxu2 %v2423_v40 }
 0x9a2   : > { %v2411_v52 = vpop.permute.xlu0 %2410 }
 0x9a3   : > { %v2413_v9 = vunpack.i.h.bf16 %v2411_v52  ;;  %v2412_v58 = vunpack.i.l.bf16 %v2411_v52  ;;  %v1646_v52 = vld [vmem:[#allocation8 + $0x140] sm:$0xff] }
 0x9a4   : > { %2192 = vmatmul.msk.f32.vlgmr.msrb.gmra.mxu2 %vm322_vm0, %v3153_v3 }
 0x9a5   : > { %1543 = vmatpush.msrb.mxu1 %v2412_v58 }
 0x9a7   : > { %1544 = vmatpush.msrb.mxu1 %v2413_v9 }
 0x9a9   : > { %1545 = vmatpush.msrb.mxu1 %v2417_v44  ;;  %v1475_v44 = vld [vmem:[#allocation8 + $0x174] sm:$0x1] }
 0x9aa   : > { %v2426_v62 = vpop.permute.xlu0 %2425 }
 0x9ab   : > { %v2428_v63 = vunpack.i.h.bf16 %v2426_v62  ;;  %v2427_v2 = vunpack.i.l.bf16 %v2426_v62  ;;  %1546 = vmatpush.msrb.mxu1 %v2418_v59 }
 0x9ad   : > { %1867 = vmatpush.msra.mxu2 %v2427_v2  ;;  %1662 = vmatpush.msra.mxu1 %v1649_v10 }
 0x9af   : > { %1868 = vmatpush.msra.mxu2 %v2428_v63  ;;  %1663 = vmatpush.msra.mxu1 %v1648_v21 }
 0x9b1   : > { %1869 = vmatpush.msra.mxu2 %v2432_v4  ;;  %1664 = vmatpush.msra.mxu1 %v1647_v51 }
 0x9b2   : > { %v1811_v11 = vpop.permute.xlu0 %1810 }
 0x9b3   : > { %1870 = vmatpush.msra.mxu2 %v2433_v14  ;;  %v1813_v18 = vsel %vm322_vm0, %v3153_v3, %v1811_v11  ;;  %1665 = vmatpush.msra.mxu1 %v1646_v52 }
 0x9b5   : > { %1871 = vmatpush.msra.mxu2 %v2437_v5 }
 0x9b7   : > { %1872 = vmatpush.msra.mxu2 %v2438_v15 }
 0x9b8   : > { %2196 = vmatmul.msk.f32.vlgmr.msra.gmra.mxu2 %vm1358_vm12, %v1813_v18  ;;  %vm1804_vm12 = vcmask 113664  }
 0x9ba   : > { %v1677_v24 = vpop.permute.xlu0 %1676 }
 0x9bb   : > { %v1681_v25 = vsel %vm1421_vm11, %v1680_v22, %v1677_v24  ;;  %vm1802_vm11 = vcmask 105472  }
 0x9bc   : > { %v3183_v32 = vrot.slane %v1681_v25, 1 }
 0xa1f   : > { %v1442_v0 = vpop.f32.mrf.mxu2 }
 0xa20   : > { %v1443_v31 = vadd.f32 %v1442_v0, %v1372_v30 }
 0xa22   : > { %v1445_v17 = vmax.f32 %v1443_v31, 0.0 }
 0xa24   : > { %2188 = vmatmul.msk.f32.vlgmr.msra.gmra.mxu3 %vm322_vm0, %v1445_v17 }
 0xa27   : > { %v1595_v20 = vpop.f32.mrf.mxu2 }
 0xa28   : > { %v1685_v33 = vmul.f32 %v3183_v32, %v1595_v20 }
 0xa2a   : > { %1706 = vrot.lane.b32.xlu0 %v1685_v33, %s2701_s22  ;;  %1700 = vrot.lane.b32.xlu2 %v1685_v33, %s2699_s3  ;;  %v1690_v13 = vsel %vm1689_vm13, %v1685_v33, 0.0 }
 0xa2b   : > { %1694 = vrot.lane.b32.xlu1 %v1685_v33, %s2698_s30 }
 0xa2c   : > { %2193 = vmatmul.msk.f32.vlgmr.msrb.gmra.mxu3 %vm322_vm0, %v3153_v3 }
 0xa55   : > { %1691 = vadd.xlane.f32.xlu1 %v1690_v13 }
 0xa84   : > { %v1701_v29 = vpop.permute.xlu2 %1700 }
 0xa85   : > { %v1703_v34 = vsel %vm1689_vm13, %v1701_v29, 0.0 }
 0xa86   : > { %1704 = vadd.xlane.f32.xlu0 %v1703_v34 }
 0xa9c   : > { %v1707_v37 = vpop.permute.xlu0 %1706 }
 0xa9d   : > { %v1695_v41 = vpop.permute.xlu1 %1694  ;;  %v1709_v38 = vsel %vm1689_vm13, %v1707_v37, 0.0 }
 0xa9e   : > { %v1697_v39 = vsel %vm1689_vm13, %v1695_v41, 0.0  ;;  %1710 = vadd.xlane.f32.xlu1 %v1709_v38 }
 0xa9f   : > { %1698 = vadd.xlane.f32.xlu2 %v1697_v39 }
 0xaa7   : > { %v1471_v45 = vpop.f32.mrf.mxu3 }
 0xaa8   : > { %v1472_v42 = vadd.f32 %v1471_v45, %v1450_v23 }
 0xaaa   : > { %2489 = vtanh.f32 %v1472_v42 }
 0xaaf   : > { %v1619_v7 = vpop.f32.mrf.mxu3 }
 0xab0   : > { %v2490_v43 = vpop.eup %2489  ;;  %v1686_v46 = vmul.f32 %v3183_v32, %v1619_v7 }
 0xab1   : > { %2189 = vmatmul.msk.f32.vlgmr.msrb.gmra.mxu0 %vm322_vm0, %v2490_v43 }
 0xab2   : > { %1728 = vrot.lane.b32.xlu0 %v1686_v46, %s2701_s22  ;;  %1937 = vmatpush.msrb.mxu0 %v3141_v57  ;;  %v1712_v1 = vsel %vm1689_vm13, %v1686_v46, 0.0 }
 0xab4   : > { %1938 = vmatpush.msrb.mxu0 %v3139_v56 }
 0xab6   : > { %1939 = vmatpush.msrb.mxu0 %v3126_v50 }
 0xab7   : > { %1722 = vrot.lane.b32.xlu2 %v1686_v46, %s2699_s3  ;;  %1716 = vrot.lane.b32.xlu1 %v1686_v46, %s2698_s30 }
 0xab8   : > { %1940 = vmatpush.msrb.mxu0 %v3124_v49 }
 0xab9   : > { %2194 = vmatmul.msk.f32.vlgmr.msra.gmra.mxu0 %vm322_vm0, %v3153_v3 }
 0xac8   : > { %v1692_v8 = vpop.xlane.xlu1 %1691 }
 0xae0   : > { %1713 = vadd.xlane.f32.xlu2 %v1712_v1 }
 0xaf9   : > { %v1705_v56 = vpop.xlane.xlu0 %1704 }
 0xb11   : > { %v1711_v40 = vpop.xlane.xlu1 %1710 }
 0xb12   : > { %v1699_v57 = vpop.xlane.xlu2 %1698 }
 0xb13   : > { %v1779_v50 = vsel %vm1778_vm14, %v1692_v8, %v1699_v57 }
 0xb14   : > { %v1781_v47 = vsel %vm1780_vm15, %v1779_v50, %v1705_v56 }
 0xb15   : > { %v1783_v49 = vsel %vm1782_vm1, %v1781_v47, %v1711_v40  ;;  %vm1808_vm1 = vcmask 130048   ;;  %v1874_v40 = vpop.f32.mrf.mxu2 }
 0xb1a   : > { %v1723_v4 = vpop.permute.xlu2 %1722 }
 0xb1b   : > { %v1725_v6 = vsel %vm1689_vm13, %v1723_v4, 0.0 }
 0xb24   : > { %v1729_v5 = vpop.permute.xlu0 %1728 }
 0xb25   : > { %v1731_v11 = vsel %vm1689_vm13, %v1729_v5, 0.0 }
 0xb29   : > { %v1717_v9 = vpop.permute.xlu1 %1716 }
 0xb2a   : > { %v1719_v58 = vsel %vm1689_vm13, %v1717_v9, 0.0 }
 0xb2b   : > { %1720 = vadd.xlane.f32.xlu0 %v1719_v58  ;;  %v1881_v58 = vld [vmem:[#allocation8 + $0x177] sm:$0x1] }
 0xb2e   : > { %v1512_v59 = vpop.f32.mrf.mxu0 }
 0xb2f   : > { %v1513_v60 = vadd.f32 %v1512_v59, %v1475_v44 }
 0xb31   : > { %v1515_v62 = vmax.f32 %v1513_v60, 0.0 }
 0xb33   : > { %2190 = vmatmul.msk.f32.vlgmr.msrb.gmra.mxu1 %vm322_vm0, %v1515_v62  ;;  %v1551_v62 = vld [vmem:[#allocation8 + $0x175] sm:$0x1] }
 0xb36   : > { %v1643_v63 = vpop.f32.mrf.mxu0 }
 0xb37   : > { %v1687_v2 = vmul.f32 %v3183_v32, %v1643_v63 }
 0xb39   : > { %1744 = vrot.lane.b32.xlu2 %v1687_v2, %s2699_s3  ;;  %1738 = vrot.lane.b32.xlu1 %v1687_v2, %s2698_s30  ;;  %v1734_v15 = vsel %vm1689_vm13, %v1687_v2, 0.0 }
 0xb3b   : > { %2195 = vmatmul.msk.f32.vlgmr.msra.gmra.mxu1 %vm322_vm0, %v3153_v3 }
 0xb3f   : > { %1750 = vrot.lane.b32.xlu0 %v1687_v2, %s2701_s22 }
 0xb53   : > { %v1714_v14 = vpop.xlane.xlu2 %1713 }
 0xb54   : > { %v1785_v48 = vsel %vm1784_vm2, %v1783_v49, %v1714_v14  ;;  %v1878_v49 = vld [vmem:[#allocation8 + $0x176] sm:$0x1] }
 0xb62   : > { %1732 = vadd.xlane.f32.xlu2 %v1731_v11 }
 0xb69   : > { %1735 = vadd.xlane.f32.xlu0 %v1734_v15 }
 0xb93   : > { %v1745_v16 = vpop.permute.xlu2 %1744 }
 0xb94   : > { %v1747_v53 = vsel %vm1689_vm13, %v1745_v16, 0.0 }
 0xb95   : > { %1748 = vadd.xlane.f32.xlu2 %v1747_v53 }
 0xb9e   : > { %v1721_v18 = vpop.xlane.xlu0 %1720 }
 0xb9f   : > { %v1787_v3 = vsel %vm1786_vm3, %v1785_v48, %v1721_v18  ;;  %v1945_v48 = vld [vmem:[#allocation8 + $0x178] sm:$0x1] }
 0xbab   : > { %v1739_v27 = vpop.permute.xlu1 %1738 }
 0xbac   : > { %v1741_v28 = vsel %vm1689_vm13, %v1739_v27, 0.0 }
 0xbb0   : > { %v3220_v19 = vpop.f32.mrf.mxu1 }
 0xbb1   : > { %v1751_v22 = vpop.permute.xlu0 %1750  ;;  %v1552_v63 = vadd.f32 %v1551_v62, %v3220_v19 }
 0xbb2   : > { %v1753_v24 = vsel %vm1689_vm13, %v1751_v22, 0.0 }
 0xbb3   : > { %1754 = vadd.xlane.f32.xlu0 %v1753_v24  ;;  %v2191_v2 = vmul.f32 -1.442695, %v1552_v63 }
 0xbb5   : > { %2491 = vpow2.f32 %v2191_v2 }
 0xbb8   : > { %v1667_v25 = vpop.f32.mrf.mxu1 }
 0xbb9   : > { %v1688_v26 = vmul.f32 %v3183_v32, %v1667_v25 }
 0xbbb   : > { %1766 = vrot.lane.b32.xlu2 %v1688_v26, %s2699_s3  ;;  %1760 = vrot.lane.b32.xlu1 %v1688_v26, %s2698_s30  ;;  %v1756_v30 = vsel %vm1689_vm13, %v1688_v26, 0.0  ;;  %v2492_v4 = vpop.eup %2491 }
 0xbbc   : > { %v1556_v14 = vadd.f32 1.0, %v2492_v4 }
 0xbbe   : > { %2493 = vrcp.f32 %v1556_v14  ;;  %vm1562_vm2 = vweird.f32 %v1556_v14  ;;  %v1566_v27 = vand.u32 2147483647, %v1556_v14 }
 0xbc4   : > { %v2494_v16 = vpop.eup %2493 }
 0xbc5   : > { %v1558_v53 = vmul.f32 %v2494_v16, %v1556_v14 }
 0xbc7   : > { %1772 = vrot.lane.b32.xlu0 %v1688_v26, %s2701_s22  ;;  %v1559_v22 = vsub.f32 1.0, %v1558_v53 }
 0xbc9   : > { %v1560_v24 = vmul.f32 %v2494_v16, %v1559_v22 }
 0xbcb   : > { %v1561_v26 = vadd.f32 %v2494_v16, %v1560_v24 }
 0xbd5   : > { %v1733_v0 = vpop.xlane.xlu2 %1732 }
 0xbdc   : > { %v1736_v20 = vpop.xlane.xlu0 %1735 }
 0xbe5   : > { %1726 = vadd.xlane.f32.xlu1 %v1725_v6  ;;  %v1568_v6 = vand.u32 2147483648, %v1556_v14 }
 0xbed   : > { %1742 = vadd.xlane.f32.xlu1 %v1741_v28 }
 0xbf5   : > { %1757 = vadd.xlane.f32.xlu1 %v1756_v30 }
 0xc08   : > { %v1749_v31 = vpop.xlane.xlu2 %1748 }
 0xc15   : > { %v1767_v17 = vpop.permute.xlu2 %1766 }
 0xc16   : > { %v1769_v32 = vsel %vm1689_vm13, %v1767_v17, 0.0 }
 0xc17   : > { %1770 = vadd.xlane.f32.xlu0 %v1769_v32  ;;  %v1569_v32 = vor.u32 1.1754944e-38, %v1568_v6 }
 0xc26   : > { %v1755_v29 = vpop.xlane.xlu0 %1754 }
 0xc2b   : > { %2445 = vrot.lane.b32.xlu0 %v3135_v55, %s2701_s22 }
 0xc2d   : > { %v1761_v33 = vpop.permute.xlu1 %1760 }
 0xc2e   : > { %v1763_v13 = vsel %vm1689_vm13, %v1761_v33, 0.0 }
 0xc2f   : > { %1764 = vadd.xlane.f32.xlu2 %v1763_v13 }
 0xc39   : > { %v1773_v34 = vpop.permute.xlu0 %1772 }
 0xc3a   : > { %v1775_v12 = vsel %vm1689_vm13, %v1773_v34, 0.0  ;;  %vm1806_vm13 = vcmask 121856   ;;  %v1968_v34 = vld [vmem:[#allocation8 + $0x17a] sm:$0x1] }
 0xc3b   : > { %1776 = vadd.xlane.f32.xlu1 %v1775_v12 }
 0xc47   : > { %2440 = vrot.lane.b32.xlu2 %v3131_v54, %s2701_s22 }
 0xc58   : > { %v1727_v35 = vpop.xlane.xlu1 %1726 }
 0xc59   : > { %v1789_v36 = vsel %vm1788_vm4, %v1787_v3, %v1727_v35 }
 0xc5a   : > { %v1791_v61 = vsel %vm1790_vm5, %v1789_v36, %v1733_v0  ;;  %vm1567_vm5 = vcmp.eq.f32.partialorder %v1566_v27, 8.507059e+37 }
 0xc5b   : > { %v1793_v37 = vsel %vm1792_vm6, %v1791_v61, %v1736_v20 }
 0xc60   : > { %v1743_v55 = vpop.xlane.xlu1 %1742 }
 0xc61   : > { %v1795_v41 = vsel %vm1794_vm7, %v1793_v37, %v1743_v55 }
 0xc62   : > { %v1797_v38 = vsel %vm1796_vm8, %v1795_v41, %v1749_v31 }
 0xc63   : > { %v1799_v39 = vsel %vm1798_vm9, %v1797_v38, %v1755_v29  ;;  %v1966_v29 = vld [vmem:[#allocation8 + $0x179] sm:$0x1]  ;;  %vm1973_vm9 = vcmask 1040384  }
 0xc68   : > { %v1758_v42 = vpop.xlane.xlu1 %1757 }
 0xc69   : > { %v1801_v54 = vsel %vm1800_vm10, %v1799_v39, %v1758_v42 }
 0xc8a   : > { %v1771_v23 = vpop.xlane.xlu0 %1770 }
 0xc9d   : > { %v2446_v43 = vpop.permute.xlu0 %2445 }
 0xc9e   : > { %v2447_v57 = vunpack.i.l.bf16 %v2446_v43  ;;  %v2448_v47 = vunpack.i.h.bf16 %v2446_v43 }
 0xca2   : > { %v1765_v45 = vpop.xlane.xlu2 %1764 }
 0xca3   : > { %v1803_v46 = vsel %vm1802_vm11, %v1801_v54, %v1765_v45 }
 0xca4   : > { %v1805_v56 = vsel %vm1804_vm12, %v1803_v46, %v1771_v23 }
 0xcaa   : > { %v2441_v7 = vpop.permute.xlu2 %2440 }
 0xcab   : > { %v2443_v1 = vunpack.i.h.bf16 %v2441_v7  ;;  %v2442_v8 = vunpack.i.l.bf16 %v2441_v7 }
 0xcad   : > { %1909 = vmatpush.msra.mxu3 %v2442_v8 }
 0xcae   : > { %v1777_v50 = vpop.xlane.xlu1 %1776 }
 0xcaf   : > { %v1807_v10 = vsel %vm1806_vm13, %v1805_v56, %v1777_v50  ;;  %1910 = vmatpush.msra.mxu3 %v2443_v1 }
 0xcb0   : > { %v1809_v21 = vsel %vm1808_vm1, %v1807_v10, 0.0 }
 0xcb1   : > { %v1877_v51 = vadd.f32 %v1874_v40, %v1809_v21  ;;  %1911 = vmatpush.msra.mxu3 %v2447_v57 }
 0xcb3   : > { %v1879_v52 = vadd.f32 %v1878_v49, %v1877_v51  ;;  %1912 = vmatpush.msra.mxu3 %v2448_v47 }
 0xcb5   : > { %v1880_v9 = vmax.f32 %v1879_v52, 0.0 }
 0xcb7   : > { %2197 = vmatmul.msk.f32.vlgmr.msra.gmra.mxu3 %vm322_vm0, %v1880_v9 }
 0xd3a   : > { %v1914_v44 = vpop.f32.mrf.mxu3 }
 0xd3b   : > { %v1915_v59 = vadd.f32 %v1914_v44, %v1881_v58 }
 0xd3d   : > { %v1917_v60 = vmax.f32 %v1915_v59, 0.0 }
 0xd3f   : > { %2198 = vmatmul.msk.f32.vlgmr.msrb.gmra.mxu0 %vm322_vm0, %v1917_v60  ;;  %vm1563_vm0 = vweird.f32 %v2494_v16 }
 0xd40   : > { %vm1564_vm3 = vmor %vm1562_vm2, %vm1563_vm0 }
 0xd41   : > { %v1565_v17 = vsel %vm1564_vm3, %v2494_v16, %v1561_v26 }
 0xd42   : > { %v1570_v13 = vsel %vm1567_vm5, %v1569_v32, %v1565_v17 }
 0xd43   : > { %v1967_v36 = vmul.f32 %v1966_v29, %v1570_v13 }
 0xdbc   : > { %v1942_v5 = vpop.f32.mrf.mxu0 }
 0xdbd   : > { %v1946_v11 = vadd.f32 %v1945_v48, %v1942_v5 }
 0xdbf   : > { %v2199_v15 = vmul.f32 -1.442695, %v1946_v11 }
 0xdc1   : > { %2495 = vpow2.f32 %v2199_v15 }
 0xdc7   : > { %v2496_v18 = vpop.eup %2495 }
 0xdc8   : > { %v1950_v3 = vadd.f32 1.0, %v2496_v18 }
 0xdca   : > { %2497 = vrcp.f32 %v1950_v3  ;;  %v1962_v30 = vand.u32 2147483648, %v1950_v3  ;;  %v1960_v31 = vand.u32 2147483647, %v1950_v3  ;;  %vm1956_vm6 = vweird.f32 %v1950_v3 }
 0xdcc   : > { %v1963_v33 = vor.u32 1.1754944e-38, %v1962_v30  ;;  %vm1961_vm8 = vcmp.eq.f32.partialorder %v1960_v31, 8.507059e+37 }
 0xdd0   : > { %v2498_v25 = vpop.eup %2497 }
 0xdd1   : > { %v1952_v19 = vmul.f32 %v2498_v25, %v1950_v3  ;;  %vm1957_vm4 = vweird.f32 %v2498_v25 }
 0xdd2   : > { %vm1958_vm7 = vmor %vm1956_vm6, %vm1957_vm4 }
 0xdd3   : > { %v1953_v28 = vsub.f32 1.0, %v1952_v19 }
 0xdd5   : > { %v1954_v0 = vmul.f32 %v2498_v25, %v1953_v28 }
 0xdd7   : > { %v1955_v20 = vadd.f32 %v2498_v25, %v1954_v0 }
 0xdd9   : > { %v1959_v12 = vsel %vm1958_vm7, %v2498_v25, %v1955_v20 }
 0xdda   : > { %v1964_v35 = vsel %vm1961_vm8, %v1963_v33, %v1959_v12 }
 0xddb   : > { %v1969_v61 = vmul.f32 %v1968_v34, %v1964_v35 }
 0xddd   : > { %v1970_v37 = vadd.f32 %v1969_v61, %v1967_v36 }
 0xddf   : > { %v1971_v55 = vsel %vm1778_vm14, %v1970_v37, 0.0 }
 0xde0   : > { %v1972_v41 = vsel %vm1780_vm15, %v1971_v55, 0.0 }
 0xde1   : > { %v1974_v38 = vsel %vm1973_vm9, %v1972_v41, 0.0 }
 0xde2   : > { %1975 = vst [vmem:[%s312_s21] sm:$0xff] %v1974_v38 }
 0xde3   : > { %2646 = shalt.err (!%p2643_p3)
}
 0xde4   : > { %2216 = dma.vmem_to_hbm [thread:$0]  (%p2817_p9), %s1990_s27, 128, %s1992_s28, %s1977_s7  }
 0xde5 PF: > { %p2239_p4 = scmp.ge.s32.totalorder %s2693_s18, 2  ;;  %s2003_s12 = sand.u32 1, %s2681_s15  }
 0xde6   : > { %s2004_s14 = scalar_lea.sflag [#allocation4], %s2003_s12 }
 0xde7   : > { %p2233_p8 = pnand %p2239_p4, %p2821_p10 }
 0xde9   : > { %p2234_p11 = pneg %p2233_p8 }
 0xdeb   : > { %2676 = dma.done.wait (%p2234_p11), %s2004_s14, 128  }
 0xdec   : > { %2678 = vsyncadd (%p2234_p11), %s2004_s14, 4294967168  ;;  %s3295_s30 = sld [smem:[#allocation15_spill]]  ;;  %p21_p0 = scmp.ge.s32.totalorder %s2748_s19, 6  }
 0xded   : > { %s3296_s15 = smov %s2685_s16  ;;  %s3297_s16 = smov %s2689_s17 }
 0xdee   : > { %s3299_s18 = smov %s2748_s19  ;;  %23 = sbr.rel (!%p21_p0) target bundleno = 11 (0xb), region = 109 }
 0xdf2   : > { %s3298_s17 = smov %s3295_s30 }
 0xdf3   :  { %2010 = vsyncpa [#allocation3], 1 }
 0xdf4   :  { %2012 = vsyncpa [#allocation3 + $0x1], 1 }
 0xdf5   :  { %2013 = vsyncpa [#allocation6], 1 }
 0xdf6   :  { %2015 = vsyncpa [#allocation6 + $0x1], 1 }
 0xdf7   :  { %2016 = vsyncpa [#allocation9], 1 }
 0xdf8   :  { %2017 = vsyncpa [#allocation4], 1 }
 0xdf9   :  { %2019 = vsyncpa [#allocation4 + $0x1], 1 }

</bundles_post_ra>
